<compile_context>
chip_gen: v6e
topology: v6e:2x2x1
jax: 0.10.0
libtpu: 0.0.40
codegen_flags: <defaults>
</compile_context>

<pallas_src>
import jax
import jax.numpy as jnp
from jax.experimental import pallas as pl
from jax.experimental.pallas import tpu as pltpu


# -----------------------------------------------------------------------------
# Pallas kernel
# -----------------------------------------------------------------------------
def _make_kernel(Np1, D, E, Vs, Ve, H, B, multi_hop_max_dist):
    M = Np1 * Np1
    K = Vs + D * Ve
    DE = D * E
    inv_E = 1.0 / float(E)

    def kernel(ab_ref, sp_ref, ei_ref, mask_ref, tabT_ref, t_ref, out_ref):
        # tabT: rows 0..Vs are spatial_pos_encoder^T, rows Vs+d*Ve.. are
        # (edge_encoder @ edge_dis_encoder[d])^T  (pre-fused in the wrapper).
        tabT = tabT_ref[...]                       # [H, K] f32
        t = t_ref[...]                             # [H, 1] f32 graph-token dist
        masks = mask_ref[...]                      # [2, M] f32
        inner = masks[0:1, :]                      # [1, M]  (i>=1 & j>=1)
        tmask = masks[1:2, :]                      # [1, M]  (row0 | col0)

        # K-axis iota shared across the B graphs of this block.
        k_iota = jax.lax.broadcasted_iota(jnp.int32, (K, M), 0)   # [K, M]
        is_sp_row = k_iota < Vs                                   # [K, M]

        for b in range(B):                         # static unroll, B is small
            ab = ab_ref[b]                         # [1, M] f32
            sp = sp_ref[b]                         # [1, M] i32 (row0/col0 = 0)
            ei = ei_ref[b]                         # [DE, M] i32, already offset
                                                   #   into absolute rows [Vs, K)

            # ---- concatenated one-hot / count matrix [K, M] --------------
            # spatial hit in rows [0, Vs), raw edge counts in rows [Vs, K).
            cnt = (k_iota == sp).astype(jnp.float32)
            for r in range(DE):
                cnt = cnt + (k_iota == ei[r:r + 1, :]).astype(jnp.float32)

            # per-column scales: spatial rows -> inner mask; edge rows ->
            # inner / (E * spatial_pos_)  (multi-hop mean + denominator).
            sp_ = jnp.where(sp == 0, 1, sp)
            sp_ = jnp.where(sp_ > 1, sp_ - 1, sp_)
            sp_ = jnp.minimum(sp_, multi_hop_max_dist)
            edge_scale = inner * (inv_E * pl.reciprocal(
                sp_.astype(jnp.float32), approx=True))            # [1, M]
            oh = cnt * jnp.where(is_sp_row, inner, edge_scale)    # [K, M]

            # ---- single wide-K MXU matmul: [H, K] @ [K, M] -> [H, M] -----
            bias = jnp.dot(tabT, oh, preferred_element_type=jnp.float32)

            # ---- compose: 2*attn_bias + masked biases + graph-token term -
            out_ref[b] = 2.0 * ab + bias + tmask * t              # [H, M]

    return kernel


def _graphs_per_block(G, M, target_rows=1024):
    """Graphs per grid step: big enough tiles, but keep >= 2 grid blocks."""
    cap = max(1, min(G, target_rows // max(M, 1)))
    if G >= 2:
        cap = min(cap, max(1, G // 2))   # leave >=2 blocks for megacore / 2 TCs
    best = 1
    for b in range(1, cap + 1):
        if G % b == 0:
            best = b
    return best


# -----------------------------------------------------------------------------
# Wrapper (glue: layout prep, table fusion, pallas_call)
# -----------------------------------------------------------------------------
def graph_attn_bias_forward(batched_data, params, num_heads, multi_hop_max_dist):
    attn_bias = batched_data['attn_bias']        # [G, N+1, N+1] f32
    spatial_pos = batched_data['spatial_pos']    # [G, N, N]     int
    edge_input = batched_data['edge_input']      # [G, N, N, Dmax, E] int

    G, Np1, _ = attn_bias.shape
    H = num_heads
    M = Np1 * Np1

    # multi-hop truncation (matches the PyTorch slicing)
    edge_input = edge_input[:, :, :, :multi_hop_max_dist, :]
    D = edge_input.shape[3]
    E = edge_input.shape[4]

    sp_tab = params['spatial_pos_encoder'].astype(jnp.float32)           # [Vs, H]
    e_tab = params['edge_encoder'].astype(jnp.float32)                   # [Ve, H]
    W = params['edge_dis_encoder'].reshape(-1, H, H)[:D].astype(jnp.float32)  # [D,H,H]
    t = params['graph_token_virtual_distance'].reshape(H, 1).astype(jnp.float32)

    Vs = sp_tab.shape[0]
    Ve = e_tab.shape[0]
    K = Vs + D * Ve

    # ---- stacked fused table, transposed to [H, K] --------------------------
    #   rows [0, Vs)             : spatial_pos_encoder
    #   rows [Vs+d*Ve, Vs+(d+1)*Ve): edge_encoder @ edge_dis_encoder[d]
    fused = jnp.einsum('vh,dhk->dvk', e_tab, W)                           # [D, Ve, H]
    tabT = jnp.concatenate([sp_tab, fused.reshape(D * Ve, H)], axis=0).T  # [H, K]

    # ---- per-graph slabs, all with M on the lane (last) axis -----------------
    ab_flat = attn_bias.reshape(G, 1, M).astype(jnp.float32)              # [G, 1, M]
    sp_pad = jnp.pad(spatial_pos.astype(jnp.int32), ((0, 0), (1, 0), (1, 0)))
    sp_flat = sp_pad.reshape(G, 1, M)                                     # [G, 1, M]

    # edge indices -> absolute rows of the stacked table, single pad pass.
    offs = Vs + Ve * jnp.arange(D, dtype=jnp.int32)                       # [D]
    ei_abs = edge_input.astype(jnp.int32) + offs[None, None, None, :, None]
    ei_abs = jnp.transpose(ei_abs, (0, 3, 4, 1, 2))                       # [G, D, E, N, N]
    ei_abs = jnp.pad(ei_abs, ((0, 0), (0, 0), (0, 0), (1, 0), (1, 0)))    # pad row0/col0
    ei_flat = ei_abs.reshape(G, D * E, M)                                 # [G, D*E, M]

    # structural masks (graph independent), lane-dense [2, M]
    m = jnp.arange(M, dtype=jnp.int32)
    ridx, cidx = m // Np1, m % Np1
    inner = ((ridx >= 1) & (cidx >= 1)).astype(jnp.float32)
    tmask = ((ridx == 0) | (cidx == 0)).astype(jnp.float32)
    masks = jnp.stack([inner, tmask], axis=0)                             # [2, M]

    B = _graphs_per_block(G, M)
    kernel = _make_kernel(Np1, D, E, Vs, Ve, H, B, multi_hop_max_dist)

    out = pl.pallas_call(
        kernel,
        out_shape=jax.ShapeDtypeStruct((G, H, M), jnp.float32),
        grid_spec=pltpu.PrefetchScalarGridSpec(
            num_scalar_prefetch=0,
            grid=(G // B,),
            in_specs=[
                pl.BlockSpec((B, 1, M), lambda g: (g, 0, 0)),        # attn_bias
                pl.BlockSpec((B, 1, M), lambda g: (g, 0, 0)),        # spatial_pos
                pl.BlockSpec((B, D * E, M), lambda g: (g, 0, 0)),    # edge indices
                pl.BlockSpec((2, M), lambda g: (0, 0)),              # masks
                pl.BlockSpec((H, K), lambda g: (0, 0)),              # fused table^T
                pl.BlockSpec((H, 1), lambda g: (0, 0)),              # graph-token t
            ],
            out_specs=pl.BlockSpec((B, H, M), lambda g: (g, 0, 0)),
        ),
        compiler_params=pltpu.CompilerParams(
            dimension_semantics=("parallel",)),
    )(ab_flat, sp_flat, ei_flat, masks, tabT, t)

    # [G, H, M] -> [G, H, N+1, N+1]; heads already on axis 1, no transpose.
    return out.reshape(G, H, Np1, Np1)


# -----------------------------------------------------------------------------
# Pure-JAX reference (mirrors the PyTorch forward) for validation
# -----------------------------------------------------------------------------
def reference_forward(batched_data, params, num_heads, multi_hop_max_dist):
    attn_bias = batched_data['attn_bias']
    spatial_pos = batched_data['spatial_pos']
    edge_input = batched_data['edge_input']

    G, Np1, _ = attn_bias.shape
    N = Np1 - 1
    H = num_heads

    gab = jnp.broadcast_to(attn_bias[:, None], (G, H, Np1, Np1))

    sp_tab = params['spatial_pos_encoder']
    spb = jnp.transpose(sp_tab[spatial_pos], (0, 3, 1, 2))               # [G,H,N,N]
    gab = gab.at[:, :, 1:, 1:].add(spb)

    t = params['graph_token_virtual_distance'].reshape(1, H, 1)
    gab = gab.at[:, :, 1:, 0].add(t)
    gab = gab.at[:, :, 0, :].add(t)

    # multi_hop branch
    sp_ = jnp.where(spatial_pos == 0, 1, spatial_pos)
    sp_ = jnp.where(sp_ > 1, sp_ - 1, sp_)
    sp_ = jnp.clip(sp_, 0, multi_hop_max_dist)
    ei = edge_input[:, :, :, :multi_hop_max_dist, :]
    e_tab = params['edge_encoder']
    ei_emb = e_tab[ei].mean(-2)                                          # [G,N,N,D,H]
    D = ei_emb.shape[-2]
    flat = jnp.transpose(ei_emb, (3, 0, 1, 2, 4)).reshape(D, -1, H)
    W = params['edge_dis_encoder'].reshape(-1, H, H)[:D]
    flat = jnp.einsum('dmh,dhk->dmk', flat, W)
    ei_emb = jnp.transpose(flat.reshape(D, G, N, N, H), (1, 2, 3, 0, 4))
    ei_b = jnp.transpose(ei_emb.sum(-2) / sp_.astype(jnp.float32)[..., None],
                         (0, 3, 1, 2))
    gab = gab.at[:, :, 1:, 1:].add(ei_b)

    gab = gab + attn_bias[:, None]
    return gab


# -----------------------------------------------------------------------------
if __name__ == "__main__":
    # hyperparameters (module __init__)
    num_heads = 8
    num_atoms = 64
    num_edges = 24           # edge vocab = num_edges + 1 = 25
    num_spatial = 16
    num_edge_dis = 8
    multi_hop_max_dist = 4
    n_layers = 6
    edge_feat = 3            # E
    dist_in = 5              # raw edge_input distance dim (truncated to 4)

    # problem sizes (G=4 so the kernel runs B=2 graphs/step over a 2-block grid)
    n_graph, n_node = 4, 8
    Np1 = n_node + 1

    key = jax.random.PRNGKey(0)
    k = iter(jax.random.split(key, 16))

    # deterministic parameter init (init_params: Embedding -> N(0, 0.02))
    params = {
        'edge_encoder': 0.02 * jax.random.normal(next(k), (num_edges + 1, num_heads), jnp.float32),
        'edge_dis_encoder': 0.02 * jax.random.normal(next(k), (num_edge_dis * num_heads * num_heads, 1), jnp.float32),
        'spatial_pos_encoder': 0.02 * jax.random.normal(next(k), (num_spatial, num_heads), jnp.float32),
        'graph_token_virtual_distance': 0.02 * jax.random.normal(next(k), (1, num_heads), jnp.float32),
    }

    batched_data = {
        'attn_bias': jax.random.normal(next(k), (n_graph, Np1, Np1), jnp.float32),
        'spatial_pos': jax.random.randint(next(k), (n_graph, n_node, n_node), 0, num_spatial, jnp.int32),
        'x': jax.random.randint(next(k), (n_graph, n_node, 1), 0, num_atoms, jnp.int32),
        'edge_input': jax.random.randint(next(k), (n_graph, n_node, n_node, dist_in, edge_feat), 0, num_edges + 1, jnp.int32),
        'attn_edge_type': jax.random.randint(next(k), (n_graph, n_node, n_node, edge_feat), 0, num_edges + 1, jnp.int32),
    }

    out = graph_attn_bias_forward(batched_data, params, num_heads, multi_hop_max_dist)
    out = jax.block_until_ready(out)

    ref = jax.block_until_ready(
        reference_forward(batched_data, params, num_heads, multi_hop_max_dist))

    assert out.shape == (n_graph, num_heads, Np1, Np1), out.shape
    assert jnp.allclose(out, ref, atol=1e-4, rtol=1e-4), float(jnp.max(jnp.abs(out - ref)))

    print("KERNEL_OK")
</pallas_src>

<mosaic_0001>
module attributes {stable_mosaic.version = 11 : i64} {
  func.func @kernel(%arg0: i32, %arg1: memref<2x1x81xf32, #tpu.memory_space<vmem>>, %arg2: memref<2x1x81xi32, #tpu.memory_space<vmem>>, %arg3: memref<2x12x81xi32, #tpu.memory_space<vmem>>, %arg4: memref<2x81xf32, #tpu.memory_space<vmem>>, %arg5: memref<8x116xf32, #tpu.memory_space<vmem>>, %arg6: memref<8x1xf32, #tpu.memory_space<vmem>>, %arg7: memref<2x8x81xf32, #tpu.memory_space<vmem>>) attributes {dimension_semantics = [#tpu.dimension_semantics<parallel>], iteration_bounds = array<i64: 2>, scalar_prefetch = 0 : i64, scratch_operands = 0 : i64, tpu.core_type = #tpu.core_type<tc>, window_params = [{transform_indices = @transform_0, window_bounds = array<i64: 2, 1, 81>}, {transform_indices = @transform_1, window_bounds = array<i64: 2, 1, 81>}, {transform_indices = @transform_2, window_bounds = array<i64: 2, 12, 81>}, {pipeline_mode = #tpu.pipeline_mode<synchronous>, transform_indices = @transform_3, window_bounds = array<i64: 2, 81>}, {pipeline_mode = #tpu.pipeline_mode<synchronous>, transform_indices = @transform_4, window_bounds = array<i64: 8, 116>}, {pipeline_mode = #tpu.pipeline_mode<synchronous>, transform_indices = @transform_5, window_bounds = array<i64: 8, 1>}, {transform_indices = @transform_6, window_bounds = array<i64: 2, 8, 81>}]} {
    %c0 = arith.constant 0 : index
    %c0_0 = arith.constant 0 : index
    %0 = vector.load %arg5[%c0, %c0_0] : memref<8x116xf32, #tpu.memory_space<vmem>>, vector<8x116xf32>
    %c0_1 = arith.constant 0 : index
    %c0_2 = arith.constant 0 : index
    %1 = vector.load %arg6[%c0_1, %c0_2] : memref<8x1xf32, #tpu.memory_space<vmem>>, vector<8x1xf32>
    %c0_3 = arith.constant 0 : index
    %c0_4 = arith.constant 0 : index
    %2 = vector.load %arg4[%c0_3, %c0_4] : memref<2x81xf32, #tpu.memory_space<vmem>>, vector<2x81xf32>
    %3 = vector.extract_strided_slice %2 {offsets = [0, 0], sizes = [1, 81], strides = [1, 1]} : vector<2x81xf32> to vector<1x81xf32>
    %4 = vector.extract_strided_slice %2 {offsets = [1, 0], sizes = [1, 81], strides = [1, 1]} : vector<2x81xf32> to vector<1x81xf32>
    %5 = tpu.iota {dimensions = array<i32: 0>} : vector<116x81xi32>
    %c16_i32 = arith.constant 16 : i32
    %6 = vector.broadcast %c16_i32 : i32 to vector<116x81xi32>
    %7 = arith.cmpi slt, %5, %6 : vector<116x81xi32>
    %c0_5 = arith.constant 0 : index
    %c0_6 = arith.constant 0 : index
    %c0_7 = arith.constant 0 : index
    %8 = vector.load %arg1[%c0_5, %c0_6, %c0_7] : memref<2x1x81xf32, #tpu.memory_space<vmem>>, vector<1x1x81xf32>
    %9 = vector.shape_cast %8 : vector<1x1x81xf32> to vector<1x81xf32>
    %c0_8 = arith.constant 0 : index
    %c0_9 = arith.constant 0 : index
    %c0_10 = arith.constant 0 : index
    %10 = vector.load %arg2[%c0_8, %c0_9, %c0_10] : memref<2x1x81xi32, #tpu.memory_space<vmem>>, vector<1x1x81xi32>
    %11 = vector.shape_cast %10 : vector<1x1x81xi32> to vector<1x81xi32>
    %c0_11 = arith.constant 0 : index
    %c0_12 = arith.constant 0 : index
    %c0_13 = arith.constant 0 : index
    %12 = vector.load %arg3[%c0_11, %c0_12, %c0_13] : memref<2x12x81xi32, #tpu.memory_space<vmem>>, vector<1x12x81xi32>
    %13 = vector.shape_cast %12 : vector<1x12x81xi32> to vector<12x81xi32>
    %14 = vector.broadcast %11 : vector<1x81xi32> to vector<116x81xi32>
    %15 = arith.cmpi eq, %5, %14 : vector<116x81xi32>
    %16 = arith.extui %15 : vector<116x81xi1> to vector<116x81xi32>
    %17 = arith.sitofp %16 : vector<116x81xi32> to vector<116x81xf32>
    %18 = vector.extract_strided_slice %13 {offsets = [0, 0], sizes = [1, 81], strides = [1, 1]} : vector<12x81xi32> to vector<1x81xi32>
    %19 = vector.broadcast %18 : vector<1x81xi32> to vector<116x81xi32>
    %20 = arith.cmpi eq, %5, %19 : vector<116x81xi32>
    %21 = arith.extui %20 : vector<116x81xi1> to vector<116x81xi32>
    %22 = arith.sitofp %21 : vector<116x81xi32> to vector<116x81xf32>
    %23 = arith.addf %17, %22 : vector<116x81xf32>
    %24 = vector.extract_strided_slice %13 {offsets = [1, 0], sizes = [1, 81], strides = [1, 1]} : vector<12x81xi32> to vector<1x81xi32>
    %25 = vector.broadcast %24 : vector<1x81xi32> to vector<116x81xi32>
    %26 = arith.cmpi eq, %5, %25 : vector<116x81xi32>
    %27 = arith.extui %26 : vector<116x81xi1> to vector<116x81xi32>
    %28 = arith.sitofp %27 : vector<116x81xi32> to vector<116x81xf32>
    %29 = arith.addf %23, %28 : vector<116x81xf32>
    %30 = vector.extract_strided_slice %13 {offsets = [2, 0], sizes = [1, 81], strides = [1, 1]} : vector<12x81xi32> to vector<1x81xi32>
    %31 = vector.broadcast %30 : vector<1x81xi32> to vector<116x81xi32>
    %32 = arith.cmpi eq, %5, %31 : vector<116x81xi32>
    %33 = arith.extui %32 : vector<116x81xi1> to vector<116x81xi32>
    %34 = arith.sitofp %33 : vector<116x81xi32> to vector<116x81xf32>
    %35 = arith.addf %29, %34 : vector<116x81xf32>
    %36 = vector.extract_strided_slice %13 {offsets = [3, 0], sizes = [1, 81], strides = [1, 1]} : vector<12x81xi32> to vector<1x81xi32>
    %37 = vector.broadcast %36 : vector<1x81xi32> to vector<116x81xi32>
    %38 = arith.cmpi eq, %5, %37 : vector<116x81xi32>
    %39 = arith.extui %38 : vector<116x81xi1> to vector<116x81xi32>
    %40 = arith.sitofp %39 : vector<116x81xi32> to vector<116x81xf32>
    %41 = arith.addf %35, %40 : vector<116x81xf32>
    %42 = vector.extract_strided_slice %13 {offsets = [4, 0], sizes = [1, 81], strides = [1, 1]} : vector<12x81xi32> to vector<1x81xi32>
    %43 = vector.broadcast %42 : vector<1x81xi32> to vector<116x81xi32>
    %44 = arith.cmpi eq, %5, %43 : vector<116x81xi32>
    %45 = arith.extui %44 : vector<116x81xi1> to vector<116x81xi32>
    %46 = arith.sitofp %45 : vector<116x81xi32> to vector<116x81xf32>
    %47 = arith.addf %41, %46 : vector<116x81xf32>
    %48 = vector.extract_strided_slice %13 {offsets = [5, 0], sizes = [1, 81], strides = [1, 1]} : vector<12x81xi32> to vector<1x81xi32>
    %49 = vector.broadcast %48 : vector<1x81xi32> to vector<116x81xi32>
    %50 = arith.cmpi eq, %5, %49 : vector<116x81xi32>
    %51 = arith.extui %50 : vector<116x81xi1> to vector<116x81xi32>
    %52 = arith.sitofp %51 : vector<116x81xi32> to vector<116x81xf32>
    %53 = arith.addf %47, %52 : vector<116x81xf32>
    %54 = vector.extract_strided_slice %13 {offsets = [6, 0], sizes = [1, 81], strides = [1, 1]} : vector<12x81xi32> to vector<1x81xi32>
    %55 = vector.broadcast %54 : vector<1x81xi32> to vector<116x81xi32>
    %56 = arith.cmpi eq, %5, %55 : vector<116x81xi32>
    %57 = arith.extui %56 : vector<116x81xi1> to vector<116x81xi32>
    %58 = arith.sitofp %57 : vector<116x81xi32> to vector<116x81xf32>
    %59 = arith.addf %53, %58 : vector<116x81xf32>
    %60 = vector.extract_strided_slice %13 {offsets = [7, 0], sizes = [1, 81], strides = [1, 1]} : vector<12x81xi32> to vector<1x81xi32>
    %61 = vector.broadcast %60 : vector<1x81xi32> to vector<116x81xi32>
    %62 = arith.cmpi eq, %5, %61 : vector<116x81xi32>
    %63 = arith.extui %62 : vector<116x81xi1> to vector<116x81xi32>
    %64 = arith.sitofp %63 : vector<116x81xi32> to vector<116x81xf32>
    %65 = arith.addf %59, %64 : vector<116x81xf32>
    %66 = vector.extract_strided_slice %13 {offsets = [8, 0], sizes = [1, 81], strides = [1, 1]} : vector<12x81xi32> to vector<1x81xi32>
    %67 = vector.broadcast %66 : vector<1x81xi32> to vector<116x81xi32>
    %68 = arith.cmpi eq, %5, %67 : vector<116x81xi32>
    %69 = arith.extui %68 : vector<116x81xi1> to vector<116x81xi32>
    %70 = arith.sitofp %69 : vector<116x81xi32> to vector<116x81xf32>
    %71 = arith.addf %65, %70 : vector<116x81xf32>
    %72 = vector.extract_strided_slice %13 {offsets = [9, 0], sizes = [1, 81], strides = [1, 1]} : vector<12x81xi32> to vector<1x81xi32>
    %73 = vector.broadcast %72 : vector<1x81xi32> to vector<116x81xi32>
    %74 = arith.cmpi eq, %5, %73 : vector<116x81xi32>
    %75 = arith.extui %74 : vector<116x81xi1> to vector<116x81xi32>
    %76 = arith.sitofp %75 : vector<116x81xi32> to vector<116x81xf32>
    %77 = arith.addf %71, %76 : vector<116x81xf32>
    %78 = vector.extract_strided_slice %13 {offsets = [10, 0], sizes = [1, 81], strides = [1, 1]} : vector<12x81xi32> to vector<1x81xi32>
    %79 = vector.broadcast %78 : vector<1x81xi32> to vector<116x81xi32>
    %80 = arith.cmpi eq, %5, %79 : vector<116x81xi32>
    %81 = arith.extui %80 : vector<116x81xi1> to vector<116x81xi32>
    %82 = arith.sitofp %81 : vector<116x81xi32> to vector<116x81xf32>
    %83 = arith.addf %77, %82 : vector<116x81xf32>
    %84 = vector.extract_strided_slice %13 {offsets = [11, 0], sizes = [1, 81], strides = [1, 1]} : vector<12x81xi32> to vector<1x81xi32>
    %85 = vector.broadcast %84 : vector<1x81xi32> to vector<116x81xi32>
    %86 = arith.cmpi eq, %5, %85 : vector<116x81xi32>
    %87 = arith.extui %86 : vector<116x81xi1> to vector<116x81xi32>
    %88 = arith.sitofp %87 : vector<116x81xi32> to vector<116x81xf32>
    %89 = arith.addf %83, %88 : vector<116x81xf32>
    %c0_i32 = arith.constant 0 : i32
    %90 = vector.broadcast %c0_i32 : i32 to vector<1x81xi32>
    %91 = arith.cmpi eq, %11, %90 : vector<1x81xi32>
    %c1_i32 = arith.constant 1 : i32
    %92 = vector.broadcast %c1_i32 : i32 to vector<1x81xi32>
    %93 = arith.select %91, %92, %11 : vector<1x81xi1>, vector<1x81xi32>
    %c1_i32_14 = arith.constant 1 : i32
    %94 = vector.broadcast %c1_i32_14 : i32 to vector<1x81xi32>
    %95 = arith.cmpi sgt, %93, %94 : vector<1x81xi32>
    %c1_i32_15 = arith.constant 1 : i32
    %96 = vector.broadcast %c1_i32_15 : i32 to vector<1x81xi32>
    %97 = arith.subi %93, %96 : vector<1x81xi32>
    %98 = arith.select %95, %97, %93 : vector<1x81xi1>, vector<1x81xi32>
    %c4_i32 = arith.constant 4 : i32
    %99 = vector.broadcast %c4_i32 : i32 to vector<1x81xi32>
    %100 = arith.minsi %98, %99 : vector<1x81xi32>
    %101 = arith.sitofp %100 : vector<1x81xi32> to vector<1x81xf32>
    %102 = tpu.reciprocal %101 {approx = true} : vector<1x81xf32> -> vector<1x81xf32>
    %cst = arith.constant 0.333333343 : f32
    %103 = vector.broadcast %cst : f32 to vector<1x81xf32>
    %104 = arith.mulf %103, %102 : vector<1x81xf32>
    %105 = arith.mulf %3, %104 : vector<1x81xf32>
    %106 = vector.shape_cast %3 : vector<1x81xf32> to vector<1x81xf32>
    %107 = vector.broadcast %106 : vector<1x81xf32> to vector<116x81xf32>
    %108 = vector.shape_cast %105 : vector<1x81xf32> to vector<1x81xf32>
    %109 = vector.broadcast %108 : vector<1x81xf32> to vector<116x81xf32>
    %110 = arith.select %7, %107, %109 : vector<116x81xi1>, vector<116x81xf32>
    %111 = arith.mulf %89, %110 : vector<116x81xf32>
    %cst_16 = arith.constant dense<0.000000e+00> : vector<8x81xf32>
    %112 = tpu.matmul %0, %111, %cst_16 {dimension_numbers = #tpu.dot_dimension_numbers<[1], [0], [0], [1], [0, 0, 1, 1], [], []>} : vector<8x116xf32>, vector<116x81xf32>, vector<8x81xf32> -> vector<8x81xf32>
    %cst_17 = arith.constant 2.000000e+00 : f32
    %113 = vector.broadcast %cst_17 : f32 to vector<1x81xf32>
    %114 = arith.mulf %113, %9 : vector<1x81xf32>
    %115 = vector.broadcast %114 : vector<1x81xf32> to vector<8x81xf32>
    %116 = arith.addf %115, %112 : vector<8x81xf32>
    %117 = vector.broadcast %4 : vector<1x81xf32> to vector<8x81xf32>
    %118 = vector.broadcast %1 : vector<8x1xf32> to vector<8x81xf32>
    %119 = arith.mulf %117, %118 : vector<8x81xf32>
    %120 = arith.addf %116, %119 : vector<8x81xf32>
    %c0_18 = arith.constant 0 : index
    %c0_19 = arith.constant 0 : index
    %c0_20 = arith.constant 0 : index
    %121 = vector.load %arg7[%c0_18, %c0_19, %c0_20] : memref<2x8x81xf32, #tpu.memory_space<vmem>>, vector<1x8x81xf32>
    %122 = vector.shape_cast %121 : vector<1x8x81xf32> to vector<8x81xf32>
    %123 = vector.shape_cast %120 : vector<8x81xf32> to vector<1x8x81xf32>
    tpu.vector_store %arg7[%c0_18, %c0_19, %c0_20], %123 {strides = array<i32>} : memref<2x8x81xf32, #tpu.memory_space<vmem>>, vector<1x8x81xf32>,
    %c1 = arith.constant 1 : index
    %c0_21 = arith.constant 0 : index
    %c0_22 = arith.constant 0 : index
    %124 = vector.load %arg1[%c1, %c0_21, %c0_22] : memref<2x1x81xf32, #tpu.memory_space<vmem>>, vector<1x1x81xf32>
    %125 = vector.shape_cast %124 : vector<1x1x81xf32> to vector<1x81xf32>
    %c1_23 = arith.constant 1 : index
    %c0_24 = arith.constant 0 : index
    %c0_25 = arith.constant 0 : index
    %126 = vector.load %arg2[%c1_23, %c0_24, %c0_25] : memref<2x1x81xi32, #tpu.memory_space<vmem>>, vector<1x1x81xi32>
    %127 = vector.shape_cast %126 : vector<1x1x81xi32> to vector<1x81xi32>
    %c1_26 = arith.constant 1 : index
    %c0_27 = arith.constant 0 : index
    %c0_28 = arith.constant 0 : index
    %128 = vector.load %arg3[%c1_26, %c0_27, %c0_28] : memref<2x12x81xi32, #tpu.memory_space<vmem>>, vector<1x12x81xi32>
    %129 = vector.shape_cast %128 : vector<1x12x81xi32> to vector<12x81xi32>
    %130 = vector.broadcast %127 : vector<1x81xi32> to vector<116x81xi32>
    %131 = arith.cmpi eq, %5, %130 : vector<116x81xi32>
    %132 = arith.extui %131 : vector<116x81xi1> to vector<116x81xi32>
    %133 = arith.sitofp %132 : vector<116x81xi32> to vector<116x81xf32>
    %134 = vector.extract_strided_slice %129 {offsets = [0, 0], sizes = [1, 81], strides = [1, 1]} : vector<12x81xi32> to vector<1x81xi32>
    %135 = vector.broadcast %134 : vector<1x81xi32> to vector<116x81xi32>
    %136 = arith.cmpi eq, %5, %135 : vector<116x81xi32>
    %137 = arith.extui %136 : vector<116x81xi1> to vector<116x81xi32>
    %138 = arith.sitofp %137 : vector<116x81xi32> to vector<116x81xf32>
    %139 = arith.addf %133, %138 : vector<116x81xf32>
    %140 = vector.extract_strided_slice %129 {offsets = [1, 0], sizes = [1, 81], strides = [1, 1]} : vector<12x81xi32> to vector<1x81xi32>
    %141 = vector.broadcast %140 : vector<1x81xi32> to vector<116x81xi32>
    %142 = arith.cmpi eq, %5, %141 : vector<116x81xi32>
    %143 = arith.extui %142 : vector<116x81xi1> to vector<116x81xi32>
    %144 = arith.sitofp %143 : vector<116x81xi32> to vector<116x81xf32>
    %145 = arith.addf %139, %144 : vector<116x81xf32>
    %146 = vector.extract_strided_slice %129 {offsets = [2, 0], sizes = [1, 81], strides = [1, 1]} : vector<12x81xi32> to vector<1x81xi32>
    %147 = vector.broadcast %146 : vector<1x81xi32> to vector<116x81xi32>
    %148 = arith.cmpi eq, %5, %147 : vector<116x81xi32>
    %149 = arith.extui %148 : vector<116x81xi1> to vector<116x81xi32>
    %150 = arith.sitofp %149 : vector<116x81xi32> to vector<116x81xf32>
    %151 = arith.addf %145, %150 : vector<116x81xf32>
    %152 = vector.extract_strided_slice %129 {offsets = [3, 0], sizes = [1, 81], strides = [1, 1]} : vector<12x81xi32> to vector<1x81xi32>
    %153 = vector.broadcast %152 : vector<1x81xi32> to vector<116x81xi32>
    %154 = arith.cmpi eq, %5, %153 : vector<116x81xi32>
    %155 = arith.extui %154 : vector<116x81xi1> to vector<116x81xi32>
    %156 = arith.sitofp %155 : vector<116x81xi32> to vector<116x81xf32>
    %157 = arith.addf %151, %156 : vector<116x81xf32>
    %158 = vector.extract_strided_slice %129 {offsets = [4, 0], sizes = [1, 81], strides = [1, 1]} : vector<12x81xi32> to vector<1x81xi32>
    %159 = vector.broadcast %158 : vector<1x81xi32> to vector<116x81xi32>
    %160 = arith.cmpi eq, %5, %159 : vector<116x81xi32>
    %161 = arith.extui %160 : vector<116x81xi1> to vector<116x81xi32>
    %162 = arith.sitofp %161 : vector<116x81xi32> to vector<116x81xf32>
    %163 = arith.addf %157, %162 : vector<116x81xf32>
    %164 = vector.extract_strided_slice %129 {offsets = [5, 0], sizes = [1, 81], strides = [1, 1]} : vector<12x81xi32> to vector<1x81xi32>
    %165 = vector.broadcast %164 : vector<1x81xi32> to vector<116x81xi32>
    %166 = arith.cmpi eq, %5, %165 : vector<116x81xi32>
    %167 = arith.extui %166 : vector<116x81xi1> to vector<116x81xi32>
    %168 = arith.sitofp %167 : vector<116x81xi32> to vector<116x81xf32>
    %169 = arith.addf %163, %168 : vector<116x81xf32>
    %170 = vector.extract_strided_slice %129 {offsets = [6, 0], sizes = [1, 81], strides = [1, 1]} : vector<12x81xi32> to vector<1x81xi32>
    %171 = vector.broadcast %170 : vector<1x81xi32> to vector<116x81xi32>
    %172 = arith.cmpi eq, %5, %171 : vector<116x81xi32>
    %173 = arith.extui %172 : vector<116x81xi1> to vector<116x81xi32>
    %174 = arith.sitofp %173 : vector<116x81xi32> to vector<116x81xf32>
    %175 = arith.addf %169, %174 : vector<116x81xf32>
    %176 = vector.extract_strided_slice %129 {offsets = [7, 0], sizes = [1, 81], strides = [1, 1]} : vector<12x81xi32> to vector<1x81xi32>
    %177 = vector.broadcast %176 : vector<1x81xi32> to vector<116x81xi32>
    %178 = arith.cmpi eq, %5, %177 : vector<116x81xi32>
    %179 = arith.extui %178 : vector<116x81xi1> to vector<116x81xi32>
    %180 = arith.sitofp %179 : vector<116x81xi32> to vector<116x81xf32>
    %181 = arith.addf %175, %180 : vector<116x81xf32>
    %182 = vector.extract_strided_slice %129 {offsets = [8, 0], sizes = [1, 81], strides = [1, 1]} : vector<12x81xi32> to vector<1x81xi32>
    %183 = vector.broadcast %182 : vector<1x81xi32> to vector<116x81xi32>
    %184 = arith.cmpi eq, %5, %183 : vector<116x81xi32>
    %185 = arith.extui %184 : vector<116x81xi1> to vector<116x81xi32>
    %186 = arith.sitofp %185 : vector<116x81xi32> to vector<116x81xf32>
    %187 = arith.addf %181, %186 : vector<116x81xf32>
    %188 = vector.extract_strided_slice %129 {offsets = [9, 0], sizes = [1, 81], strides = [1, 1]} : vector<12x81xi32> to vector<1x81xi32>
    %189 = vector.broadcast %188 : vector<1x81xi32> to vector<116x81xi32>
    %190 = arith.cmpi eq, %5, %189 : vector<116x81xi32>
    %191 = arith.extui %190 : vector<116x81xi1> to vector<116x81xi32>
    %192 = arith.sitofp %191 : vector<116x81xi32> to vector<116x81xf32>
    %193 = arith.addf %187, %192 : vector<116x81xf32>
    %194 = vector.extract_strided_slice %129 {offsets = [10, 0], sizes = [1, 81], strides = [1, 1]} : vector<12x81xi32> to vector<1x81xi32>
    %195 = vector.broadcast %194 : vector<1x81xi32> to vector<116x81xi32>
    %196 = arith.cmpi eq, %5, %195 : vector<116x81xi32>
    %197 = arith.extui %196 : vector<116x81xi1> to vector<116x81xi32>
    %198 = arith.sitofp %197 : vector<116x81xi32> to vector<116x81xf32>
    %199 = arith.addf %193, %198 : vector<116x81xf32>
    %200 = vector.extract_strided_slice %129 {offsets = [11, 0], sizes = [1, 81], strides = [1, 1]} : vector<12x81xi32> to vector<1x81xi32>
    %201 = vector.broadcast %200 : vector<1x81xi32> to vector<116x81xi32>
    %202 = arith.cmpi eq, %5, %201 : vector<116x81xi32>
    %203 = arith.extui %202 : vector<116x81xi1> to vector<116x81xi32>
    %204 = arith.sitofp %203 : vector<116x81xi32> to vector<116x81xf32>
    %205 = arith.addf %199, %204 : vector<116x81xf32>
    %c0_i32_29 = arith.constant 0 : i32
    %206 = vector.broadcast %c0_i32_29 : i32 to vector<1x81xi32>
    %207 = arith.cmpi eq, %127, %206 : vector<1x81xi32>
    %c1_i32_30 = arith.constant 1 : i32
    %208 = vector.broadcast %c1_i32_30 : i32 to vector<1x81xi32>
    %209 = arith.select %207, %208, %127 : vector<1x81xi1>, vector<1x81xi32>
    %c1_i32_31 = arith.constant 1 : i32
    %210 = vector.broadcast %c1_i32_31 : i32 to vector<1x81xi32>
    %211 = arith.cmpi sgt, %209, %210 : vector<1x81xi32>
    %c1_i32_32 = arith.constant 1 : i32
    %212 = vector.broadcast %c1_i32_32 : i32 to vector<1x81xi32>
    %213 = arith.subi %209, %212 : vector<1x81xi32>
    %214 = arith.select %211, %213, %209 : vector<1x81xi1>, vector<1x81xi32>
    %c4_i32_33 = arith.constant 4 : i32
    %215 = vector.broadcast %c4_i32_33 : i32 to vector<1x81xi32>
    %216 = arith.minsi %214, %215 : vector<1x81xi32>
    %217 = arith.sitofp %216 : vector<1x81xi32> to vector<1x81xf32>
    %218 = tpu.reciprocal %217 {approx = true} : vector<1x81xf32> -> vector<1x81xf32>
    %cst_34 = arith.constant 0.333333343 : f32
    %219 = vector.broadcast %cst_34 : f32 to vector<1x81xf32>
    %220 = arith.mulf %219, %218 : vector<1x81xf32>
    %221 = arith.mulf %3, %220 : vector<1x81xf32>
    %222 = vector.shape_cast %3 : vector<1x81xf32> to vector<1x81xf32>
    %223 = vector.broadcast %222 : vector<1x81xf32> to vector<116x81xf32>
    %224 = vector.shape_cast %221 : vector<1x81xf32> to vector<1x81xf32>
    %225 = vector.broadcast %224 : vector<1x81xf32> to vector<116x81xf32>
    %226 = arith.select %7, %223, %225 : vector<116x81xi1>, vector<116x81xf32>
    %227 = arith.mulf %205, %226 : vector<116x81xf32>
    %cst_35 = arith.constant dense<0.000000e+00> : vector<8x81xf32>
    %228 = tpu.matmul %0, %227, %cst_35 {dimension_numbers = #tpu.dot_dimension_numbers<[1], [0], [0], [1], [0, 0, 1, 1], [], []>} : vector<8x116xf32>, vector<116x81xf32>, vector<8x81xf32> -> vector<8x81xf32>
    %cst_36 = arith.constant 2.000000e+00 : f32
    %229 = vector.broadcast %cst_36 : f32 to vector<1x81xf32>
    %230 = arith.mulf %229, %125 : vector<1x81xf32>
    %231 = vector.broadcast %230 : vector<1x81xf32> to vector<8x81xf32>
    %232 = arith.addf %231, %228 : vector<8x81xf32>
    %233 = vector.broadcast %4 : vector<1x81xf32> to vector<8x81xf32>
    %234 = vector.broadcast %1 : vector<8x1xf32> to vector<8x81xf32>
    %235 = arith.mulf %233, %234 : vector<8x81xf32>
    %236 = arith.addf %232, %235 : vector<8x81xf32>
    %c1_37 = arith.constant 1 : index
    %c0_38 = arith.constant 0 : index
    %c0_39 = arith.constant 0 : index
    %237 = vector.load %arg7[%c1_37, %c0_38, %c0_39] : memref<2x8x81xf32, #tpu.memory_space<vmem>>, vector<1x8x81xf32>
    %238 = vector.shape_cast %237 : vector<1x8x81xf32> to vector<8x81xf32>
    %239 = vector.shape_cast %236 : vector<8x81xf32> to vector<1x8x81xf32>
    tpu.vector_store %arg7[%c1_37, %c0_38, %c0_39], %239 {strides = array<i32>} : memref<2x8x81xf32, #tpu.memory_space<vmem>>, vector<1x8x81xf32>,
    return
  }
  func.func @transform_0(%arg0: i32) -> (i32, i32, i32) {
    %c0_i32 = arith.constant 0 : i32
    %c0_i32_0 = arith.constant 0 : i32
    %c0_i32_1 = arith.constant 0 : i32
    return %arg0, %c0_i32, %c0_i32_0 : i32, i32, i32
  }
  func.func @transform_1(%arg0: i32) -> (i32, i32, i32) {
    %c0_i32 = arith.constant 0 : i32
    %c0_i32_0 = arith.constant 0 : i32
    %c0_i32_1 = arith.constant 0 : i32
    return %arg0, %c0_i32, %c0_i32_0 : i32, i32, i32
  }
  func.func @transform_2(%arg0: i32) -> (i32, i32, i32) {
    %c0_i32 = arith.constant 0 : i32
    %c0_i32_0 = arith.constant 0 : i32
    %c0_i32_1 = arith.constant 0 : i32
    return %arg0, %c0_i32, %c0_i32_0 : i32, i32, i32
  }
  func.func @transform_3(%arg0: i32) -> (i32, i32) {
    %c0_i32 = arith.constant 0 : i32
    %c0_i32_0 = arith.constant 0 : i32
    %c0_i32_1 = arith.constant 0 : i32
    return %c0_i32, %c0_i32_0 : i32, i32
  }
  func.func @transform_4(%arg0: i32) -> (i32, i32) {
    %c0_i32 = arith.constant 0 : i32
    %c0_i32_0 = arith.constant 0 : i32
    %c0_i32_1 = arith.constant 0 : i32
    return %c0_i32, %c0_i32_0 : i32, i32
  }
  func.func @transform_5(%arg0: i32) -> (i32, i32) {
    %c0_i32 = arith.constant 0 : i32
    %c0_i32_0 = arith.constant 0 : i32
    %c0_i32_1 = arith.constant 0 : i32
    return %c0_i32, %c0_i32_0 : i32, i32
  }
  func.func @transform_6(%arg0: i32) -> (i32, i32, i32) {
    %c0_i32 = arith.constant 0 : i32
    %c0_i32_0 = arith.constant 0 : i32
    %c0_i32_1 = arith.constant 0 : i32
    return %arg0, %c0_i32, %c0_i32_0 : i32, i32, i32
  }
}

</mosaic_0001>

<bundles_post_ra>
// kernel: tpu_custom_call.1
= control target key start
LH: loop header
LB: loop body
LE: loop exit
PB: predicated region body
PF: predicated region fallthrough
CT: control target
= control target key end

     0   :  { %11 = vsyncpa [#allocation3], 0  ;;  %s4772_s0 = inlined_call_operand.vmem [shape: f32[4,1,81], index: 0, kind: input, shape index: {}]   ;;  %s4773_s1 = inlined_call_operand.vmem [shape: s32[4,1,81], index: 1, kind: input, shape index: {}]   ;;  %s4774_s2 = inlined_call_operand.vmem [shape: s32[4,12,81], index: 2, kind: input, shape index: {}]   ;;  %s4775_s3 = inlined_call_operand.vmem [shape: f32[2,81], index: 3, kind: input, shape index: {}]   ;;  %s4776_s4 = inlined_call_operand.vmem [shape: f32[8,116], index: 4, kind: input, shape index: {}]   ;;  %s4777_s5 = inlined_call_operand.vmem [shape: f32[8,1], index: 5, kind: input, shape index: {}]   ;;  %s4778_s6 = inlined_call_operand.hbm [shape: f32[4,8,81], index: 6, kind: output, shape index: {}]  }
   0x1   :  { %13 = vsyncpa [#allocation3 + $0x1], 0  ;;  %s3013_s21 = smov 0   ;;  %s3015_s22 = smov 0  }
   0x2   :  { %s3017_s23 = smov 0   ;;  %s3019_s24 = smov 0  }
   0x3 LB: > { %s3034_s25 = sadd.s32 4294967295, %s2970_s24   ;;  %s2344_s26 = sadd.s32 4294967294, %s2970_s24   ;;  %s2970_s24 = sphi %s3019_s24, %s4784_s24   ;;  %s2966_s23 = sphi %s3017_s23, %s4783_s23   ;;  %s2962_s22 = sphi %s3015_s22, %s4782_s22   ;;  %s2958_s21 = sphi %s3013_s21, %s4781_s21  }
   0x4   : > { %s3038_s27 = sadd.s32 1, %s2970_s24   ;;  %s167_s28 = sadd.s32 1, %s2966_s23 }
   0x5   : > { %s164_s29 = ssub.s32 %s2970_s24, %s3038_s27  ;;  %p177_p0 = scmp.ne.s32.totalorder %s2966_s23, %s2962_s22 }
   0x6   : > { %p165_p1 = scmp.eq.s32.totalorder %s164_s29, 0  ;;  %p178_p2 = scmp.eq.s32.totalorder %s3034_s25, 1 }
   0x7   : > { %p183_p3 = scmp.ne.s32.totalorder %s2962_s22, %s2958_s21  ;;  %p184_p4 = scmp.eq.s32.totalorder %s2344_s26, 1 }
   0x8   : > { %s3049_s30 = scalar_select %p165_p1, %s2966_s23, %s167_s28  }
   0x9   : > { %p3051_p5 = por %p178_p2, %p177_p0  ;;  %p3055_p6 = por %p184_p4, %p183_p3 }
   0xa   : > { %p2347_p7 = scmp.ge.s32.totalorder %s2970_s24, 1  ;;  %p237_p8 = scmp.lt.s32.totalorder %s2970_s24, 3 }
   0xc   : > { %p238_p9 = pnand %p2347_p7, %p237_p8 }
   0xd   : > { %s2349_s9 = sshll.u32 (!%p238_p9), %s3034_s25, 1  ;;  %s273_s14 = sand.u32 (!%p238_p9), 1, %s2962_s22  }
   0xe   : > { %241 = sbr.rel (%p238_p9) target bundleno = 559 (0x22f), region = 44  ;;  %p277_p10 = scmp.lt.s32.totalorder (!%p238_p9), %s2349_s9, 3 }
   0xf   : > { %s2348_s15 = sshll.u32 (!%p238_p9), %s273_s14, 4  ;;  %s2761_s17 = sshll.u32 (!%p238_p9), %s3034_s25, 8 }
  0x10   : > { %s4728_s20 = scalar_lea.hbm (!%p238_p9), %s4778_s6, %s2761_s17  ;;  %s4732_s26 = scalar_lea.sflag (!%p238_p9), [#allocation3], %s273_s14 }
  0x11   : > { %s2975_s25 = smov (!%p238_p9), [#allocation2]  }
  0x12   : > { %s2914_s29 = sshll.u32 (!%p238_p9), %s2975_s25, 4  ;;  %s2915_s29 = int_to_ptr.vmem [resolvable:$false] %s2914_s29 }
  0x13   : > { %v297_v0 = vlaneseq  ;;  %v2972_v1 = vmov 0.0   ;;  %s4786_s9 = smov (!%p277_p10, %s2349_s9), 3  ;;  %s2916_s10 = scalar_lea.vmem %s2915_s29, 512 }
  0x14   : > { %2794 = vmatprep.subr.mxu0 %v2972_v1  ;;  %2827 = vmatprep.subr.mxu1 %v2972_v1  ;;  %s284_s12 = scalar_lea.vmem %s4773_s1, %s4786_s9  ;;  %s2760_s13 = sshll.u32 %s4786_s9, 4 }
  0x15   : > { %v3064_v2 = vshrl.u32 %v297_v0, 7  ;;  %s3094_s16 = scalar_lea.vmem %s4774_s2, %s2760_s13  ;;  %v329_v11 = vld [vmem:[%s284_s12] sm:$0x1]  ;;  %v3139_v27 = vld [vmem:[%s284_s12 + $0x1] sm:$0x1]  ;;  %s279_s13 = scalar_lea.vmem %s4772_s0, %s4786_s9 }
  0x16   : > { %v330_v12 = vld [vmem:[%s3094_s16] sm:$0xff]  ;;  %v331_v23 = vld [vmem:[%s3094_s16 + $0x8] sm:$0xf]  ;;  %vm1149_vm5 = vcmp.eq.s32.totalorder %v329_v11, 0  ;;  %v2554_v40 = vld [vmem:[%s3094_s16 + $0x10] sm:$0xff]  ;;  %vm2121_vm14 = vcmp.eq.s32.totalorder %v3139_v27, 0 }
  0x17   : > { %v3069_v3 = vadd.s32 112, %v3064_v2  ;;  %v3072_v4 = vsub.s32 0, %v3064_v2  ;;  %v3075_v5 = vsub.s32 1, %v3064_v2  ;;  %v3078_v6 = vsub.s32 2, %v3064_v2  ;;  %v2555_v47 = vld [vmem:[%s3094_s16 + $0x18] sm:$0xf] }
  0x18   : > { %v3086_v7 = vsub.s32 3, %v3064_v2  ;;  %v639_v8 = vsub.s32 4, %v3064_v2  ;;  %v703_v9 = vsub.s32 5, %v3064_v2  ;;  %v767_v10 = vsub.s32 6, %v3064_v2  ;;  %s275_s9 = scalar_lea.vmem [#allocation2], %s2348_s15 }
  0x19   : > { %v3098_v13 = vrot.slane %v329_v11, %v3072_v4  ;;  %v831_v14 = vsub.s32 7, %v3064_v2  ;;  %v3102_v15 = vrot.slane %v330_v12, %v3072_v4  ;;  %v3105_v16 = vrot.slane %v330_v12, %v3075_v5  ;;  %s2264_s16 = sshll.u32 %s275_s9, 4  ;;  %s4730_s16 = int_to_ptr.vmem [resolvable:$true] %s2264_s16 }
  0x1a   : > { %v3108_v17 = vrot.slane %v330_v12, %v3078_v6  ;;  %v3111_v18 = vrot.slane %v330_v12, %v3086_v7  ;;  %v3117_v19 = vrot.slane %v330_v12, %v639_v8  ;;  %v3121_v20 = vrot.slane %v330_v12, %v703_v9  ;;  %s2910_s28 = scalar_lea.vmem %s4730_s16, 256  ;;  %p2917_p0 = scmp.lt.s32.totalorder %s4730_s16, %s2915_s29 }
  0x1b   : > { %vm350_vm0 = vcmp.eq.s32.totalorder %v3069_v3, %v3098_v13  ;;  %v3125_v21 = vrot.slane %v330_v12, %v767_v10  ;;  %vm399_vm1 = vcmp.eq.s32.totalorder %v3069_v3, %v3102_v15  ;;  %vm463_vm2 = vcmp.eq.s32.totalorder %v3069_v3, %v3105_v16  ;;  %p2911_p11 = scmp.ne.s32.totalorder %s4730_s16, %s2910_s28  ;;  %p2918_p1 = scmp.lt.s32.totalorder %s2916_s10, %s2910_s28 }
  0x1c   : > { %v2368_v22 = vsel %vm350_vm0, 1.0, %v2972_v1  ;;  %vm527_vm3 = vcmp.eq.s32.totalorder %v3069_v3, %v3108_v17  ;;  %v2383_v24 = vsel %vm399_vm1, 1.0, %v2972_v1  ;;  %v2398_v25 = vsel %vm463_vm2, 1.0, %v2972_v1 }
  0x1d   : > { %v444_v26 = vadd.f32 %v2383_v24, %v2368_v22  ;;  %vm591_vm4 = vcmp.eq.s32.totalorder %v3069_v3, %v3111_v18  ;;  %v3142_v28 = vadd.s32 104, %v3064_v2  ;;  %v2413_v29 = vsel %vm527_vm3, 1.0, %v2972_v1  ;;  %p2912_p12 = pnand %p2911_p11, %p3051_p5  ;;  %p2919_p2 = por %p2918_p1, %p2917_p0 }
  0x1e   : > { %vm655_vm6 = vcmp.eq.s32.totalorder %v3069_v3, %v3117_v19  ;;  %vm719_vm7 = vcmp.eq.s32.totalorder %v3069_v3, %v3121_v20  ;;  %v3151_v30 = vrot.slane %v330_v12, %v831_v14  ;;  %vm783_vm8 = vcmp.eq.s32.totalorder %v3069_v3, %v3125_v21 }
  0x1f   : > { %v508_v31 = vadd.f32 %v2398_v25, %v444_v26  ;;  %v3156_v32 = vrot.slane %v331_v23, %v3072_v4  ;;  %v3159_v33 = vrot.slane %v331_v23, %v3075_v5  ;;  %v2428_v34 = vsel %vm591_vm4, 1.0, %v2972_v1  ;;  %p2913_p13 = pneg %p2912_p12 }
  0x20   : > { %vm847_vm9 = vcmp.eq.s32.totalorder %v3069_v3, %v3151_v30  ;;  %v1150_v35 = vsel %vm1149_vm5, 1, %v329_v11  ;;  %v3166_v36 = vrot.slane %v3139_v27, %v3072_v4  ;;  %v2443_v38 = vsel %vm655_vm6, 1.0, %v2972_v1 }
  0x21   : > { %v572_v37 = vadd.f32 %v2413_v29, %v508_v31  ;;  %vm911_vm10 = vcmp.eq.s32.totalorder %v3069_v3, %v3156_v32  ;;  %v3172_v39 = vrot.slane %v331_v23, %v3078_v6  ;;  %v2458_v41 = vsel %vm719_vm7, 1.0, %v2972_v1  ;;  %p2920_p3 = pnand %p2919_p2, %p2913_p13 }
  0x22   : > { %v2473_v42 = vsel %vm783_vm8, 1.0, %v2972_v1  ;;  %vm975_vm11 = vcmp.eq.s32.totalorder %v3069_v3, %v3159_v33  ;;  %v3180_v43 = vrot.slane %v331_v23, %v3086_v7  ;;  %v2488_v45 = vsel %vm847_vm9, 1.0, %v2972_v1 }
  0x23   : > { %v636_v44 = vadd.f32 %v2428_v34, %v572_v37  ;;  %v2503_v46 = vsel %vm911_vm10, 1.0, %v2972_v1  ;;  %vm1151_vm12 = vcmp.gt.s32.totalorder %v1150_v35, 1  ;;  %v2549_v48 = vadd.s32 4294967295, %v1150_v35 }
  0x24   : > { %v3186_v49 = vrot.slane %v2554_v40, %v3072_v4  ;;  %v3189_v50 = vrot.slane %v2554_v40, %v3075_v5  ;;  %v3192_v51 = vrot.slane %v2554_v40, %v3078_v6  ;;  %v2518_v53 = vsel %vm975_vm11, 1.0, %v2972_v1 }
  0x25   : > { %v700_v52 = vadd.f32 %v2443_v38, %v636_v44  ;;  %vm1039_vm13 = vcmp.eq.s32.totalorder %v3069_v3, %v3172_v39  ;;  %v3198_v54 = vrot.slane %v2554_v40, %v3086_v7  ;;  %v1153_v55 = vsel %vm1151_vm12, %v2549_v48, %v1150_v35 }
  0x26   : > { %v3203_v56 = vrot.slane %v2554_v40, %v639_v8  ;;  %v3206_v57 = vrot.slane %v2555_v47, %v3072_v4  ;;  %vm1322_vm15 = vcmp.eq.s32.totalorder %v3069_v3, %v3166_v36  ;;  %vm1154_vm0 = vcmp.lt.s32.totalorder %v1153_v55, 4 }
  0x27   : > { %v764_v58 = vadd.f32 %v2458_v41, %v700_v52  ;;  %v2570_v59 = vsel %vm1322_vm15, 1.0, %v2972_v1  ;;  %vm1371_vm1 = vcmp.eq.s32.totalorder %v3069_v3, %v3186_v49  ;;  %v1155_v60 = vsel %vm1154_vm0, %v1153_v55, 4 }
  0x28   : > { %v2585_v61 = vsel %vm1371_vm1, 1.0, %v2972_v1  ;;  %vm1435_vm2 = vcmp.eq.s32.totalorder %v3069_v3, %v3189_v50  ;;  %vm1499_vm3 = vcmp.eq.s32.totalorder %v3069_v3, %v3192_v51  ;;  %v1156_v63 = vcvt.s32.f32 %v1155_v60 }
  0x29   : > { %v828_v62 = vadd.f32 %v2473_v42, %v764_v58  ;;  %v1416_v0 = vadd.f32 %v2585_v61, %v2570_v59  ;;  %v2600_v8 = vsel %vm1435_vm2, 1.0, %v2972_v1  ;;  %vm1103_vm4 = vcmp.eq.s32.totalorder %v3069_v3, %v3180_v43 }
  0x2a   : > { %v2615_v11 = vsel %vm1499_vm3, 1.0, %v2972_v1  ;;  %vm1563_vm5 = vcmp.eq.s32.totalorder %v3069_v3, %v3198_v54  ;;  %v3226_v12 = vrot.slane %v2554_v40, %v703_v9  ;;  %2905 = vrcp.f32 %v1156_v63 }
  0x2b   : > { %v892_v22 = vadd.f32 %v2488_v45, %v828_v62  ;;  %v1480_v23 = vadd.f32 %v2600_v8, %v1416_v0  ;;  %vm1627_vm6 = vcmp.eq.s32.totalorder %v3069_v3, %v3203_v56  ;;  %v3231_v24 = vrot.slane %v2555_v47, %v3075_v5 }
  0x2c   : > { %v2630_v25 = vsel %vm1563_vm5, 1.0, %v2972_v1  ;;  %v3236_v26 = vrot.slane %v2554_v40, %v767_v10  ;;  %v3240_v29 = vrot.slane %v2554_v40, %v831_v14  ;;  %vm1691_vm7 = vcmp.eq.s32.totalorder %v3069_v3, %v3226_v12 }
  0x2d   : > { %v956_v9 = vadd.f32 %v2503_v46, %v892_v22  ;;  %v1544_v31 = vadd.f32 %v2615_v11, %v1480_v23  ;;  %vm1883_vm8 = vcmp.eq.s32.totalorder %v3069_v3, %v3206_v57  ;;  %v2533_v34 = vsel %vm1039_vm13, 1.0, %v2972_v1  ;;  %v3297_v11 = vld [vmem:[%s4775_s3] sm:$0x3] }
  0x2e   : > { %v2645_v10 = vsel %vm1627_vm6, 1.0, %v2972_v1  ;;  %vm1755_vm9 = vcmp.eq.s32.totalorder %v3069_v3, %v3236_v26  ;;  %vm1819_vm10 = vcmp.eq.s32.totalorder %v3069_v3, %v3240_v29  ;;  %v2548_v35 = vsel %vm1103_vm4, 1.0, %v2972_v1 }
  0x2f   : > { %v1020_v14 = vadd.f32 %v2518_v53, %v956_v9  ;;  %v3260_v37 = vrot.slane %v2555_v47, %v3078_v6  ;;  %v1608_v38 = vadd.f32 %v2630_v25, %v1544_v31  ;;  %v2660_v40 = vsel %vm1691_vm7, 1.0, %v2972_v1 }
  0x30   : > { %v2705_v41 = vsel %vm1883_vm8, 1.0, %v2972_v1  ;;  %vm1947_vm11 = vcmp.eq.s32.totalorder %v3069_v3, %v3231_v24  ;;  %v2122_v42 = vsel %vm2121_vm14, 1, %v3139_v27  ;;  %v2675_v45 = vsel %vm1755_vm9, 1.0, %v2972_v1 }
  0x31   : > { %v1672_v44 = vadd.f32 %v2645_v10, %v1608_v38  ;;  %v2690_v46 = vsel %vm1819_vm10, 1.0, %v2972_v1  ;;  %vm2123_vm12 = vcmp.gt.s32.totalorder %v2122_v42, 1  ;;  %v3272_v6 = vrot.slane %v2555_v47, %v3086_v7 }
  0x32   : > { %v2751_v48 = vadd.s32 4294967295, %v2122_v42  ;;  %vm349_vm13 = vcmp.eq.s32.totalorder %v3142_v28, %v3098_v13  ;;  %vm398_vm15 = vcmp.eq.s32.totalorder %v3142_v28, %v3102_v15  ;;  %v1084_v52 = vadd.f32 %v2533_v34, %v1020_v14 }
  0x33   : > { %v1736_v53 = vadd.f32 %v2660_v40, %v1672_v44  ;;  %vm2011_vm14 = vcmp.eq.s32.totalorder %v3069_v3, %v3260_v37  ;;  %v2367_v27 = vsel %vm349_vm13, 1.0, %v2972_v1  ;;  %v2382_v58 = vsel %vm398_vm15, 1.0, %v2972_v1 }
  0x34   : > { %v2125_v55 = vsel %vm2123_vm12, %v2751_v48, %v2122_v42  ;;  %vm462_vm0 = vcmp.eq.s32.totalorder %v3142_v28, %v3105_v16  ;;  %vm526_vm1 = vcmp.eq.s32.totalorder %v3142_v28, %v3108_v17  ;;  %v443_v47 = vadd.f32 %v2382_v58, %v2367_v27 }
  0x35   : > { %v1800_v7 = vadd.f32 %v2675_v45, %v1736_v53  ;;  %vm2126_vm2 = vcmp.lt.s32.totalorder %v2125_v55, 4  ;;  %v2397_v59 = vsel %vm462_vm0, 1.0, %v2972_v1  ;;  %vm1202_vm3 = vcmask 1043456  }
  0x36   : > { %vm2075_vm4 = vcmp.eq.s32.totalorder %v3069_v3, %v3272_v6  ;;  %v2127_v60 = vsel %vm2126_vm2, %v2125_v55, 4  ;;  %v2412_v61 = vsel %vm526_vm1, 1.0, %v2972_v1  ;;  %vm590_vm5 = vcmp.eq.s32.totalorder %v3142_v28, %v3111_v18 }
  0x37   : > { %v1864_v62 = vadd.f32 %v2690_v46, %v1800_v7  ;;  %v2128_v63 = vcvt.s32.f32 %v2127_v60  ;;  %v507_v0 = vadd.f32 %v2397_v59, %v443_v47  ;;  %vm654_vm6 = vcmp.eq.s32.totalorder %v3142_v28, %v3117_v19  ;;  %v2906_v8 = vpop.eup %2905 }
  0x38   : > { %v2427_v22 = vsel %vm590_vm5, 1.0, %v2972_v1  ;;  %vm718_vm7 = vcmp.eq.s32.totalorder %v3142_v28, %v3121_v20  ;;  %vm782_vm8 = vcmp.eq.s32.totalorder %v3142_v28, %v3125_v21  ;;  %vm846_vm9 = vcmp.eq.s32.totalorder %v3142_v28, %v3151_v30 }
  0x39   : > { %v1158_v23 = vmul.f32 0.33333334, %v2906_v8  ;;  %v1928_v25 = vadd.f32 %v2705_v41, %v1864_v62  ;;  %2907 = vrcp.f32 %v2128_v63  ;;  %v571_v9 = vadd.f32 %v2412_v61, %v507_v0 }
  0x3a   : > { %v2720_v31 = vsel %vm1947_vm11, 1.0, %v2972_v1  ;;  %v2735_v34 = vsel %vm2011_vm14, 1.0, %v2972_v1  ;;  %v2442_v10 = vsel %vm654_vm6, 1.0, %v2972_v1  ;;  %vm910_vm10 = vcmp.eq.s32.totalorder %v3142_v28, %v3156_v32 }
  0x3b   : > { %v1148_v14 = vadd.f32 %v2548_v35, %v1084_v52  ;;  %v1159_v38 = vmul.f32 %v1158_v23, %v3297_v11  ;;  %v2750_v40 = vsel %vm2075_vm4, 1.0, %v2972_v1  ;;  %v635_v41 = vadd.f32 %v2427_v22, %v571_v9 }
  0x3c   : > { %v2457_v42 = vsel %vm718_vm7, 1.0, %v2972_v1  ;;  %v2472_v44 = vsel %vm782_vm8, 1.0, %v2972_v1  ;;  %v2487_v45 = vsel %vm846_vm9, 1.0, %v2972_v1  ;;  %vm1321_vm11 = vcmp.eq.s32.totalorder %v3142_v28, %v3166_v36 }
  0x3d   : > { %v3328_v46 = vrot.slane %v1159_v38, %v3072_v4  ;;  %v1992_v35 = vadd.f32 %v2720_v31, %v1928_v25  ;;  %v699_v48 = vadd.f32 %v2442_v10, %v635_v41  ;;  %v2502_v52 = vsel %vm910_vm10, 1.0, %v2972_v1 }
  0x3e   : > { %vm974_vm12 = vcmp.eq.s32.totalorder %v3142_v28, %v3159_v33  ;;  %vm1038_vm13 = vcmp.eq.s32.totalorder %v3142_v28, %v3172_v39  ;;  %v2569_v3 = vsel %vm1321_vm11, 1.0, %v2972_v1  ;;  %vm1370_vm15 = vcmp.eq.s32.totalorder %v3142_v28, %v3186_v49 }
  0x3f   : > { %v1197_v53 = vmul.f32 %v3328_v46, %v1148_v14  ;;  %v763_v27 = vadd.f32 %v2457_v42, %v699_v48  ;;  %vm1102_vm14 = vcmp.eq.s32.totalorder %v3142_v28, %v3180_v43  ;;  %v2584_v55 = vsel %vm1370_vm15, 1.0, %v2972_v1 }
  0x40   : > { %v1415_v58 = vadd.f32 %v2584_v55, %v2569_v3  ;;  %vm1434_vm0 = vcmp.eq.s32.totalorder %v3142_v28, %v3189_v50  ;;  %vm1498_vm1 = vcmp.eq.s32.totalorder %v3142_v28, %v3192_v51  ;;  %vm1562_vm2 = vcmp.eq.s32.totalorder %v3142_v28, %v3198_v54 }
  0x41   : > { %2795 = vmatpush3.msk.msra.mxu0 %vm1202_vm3, %v1197_v53  ;;  %v2056_v7 = vadd.f32 %v2735_v34, %v1992_v35  ;;  %v827_v47 = vadd.f32 %v2472_v44, %v763_v27  ;;  %v2599_v59 = vsel %vm1434_vm0, 1.0, %v2972_v1  ;;  %v2614_v60 = vsel %vm1498_vm1, 1.0, %v2972_v1 }
  0x42   : > { %2796 = vmatprep.subr.mxu0 %v2972_v1  ;;  %v2517_v61 = vsel %vm974_vm12, 1.0, %v2972_v1  ;;  %v1479_v62 = vadd.f32 %v2599_v59, %v1415_v58  ;;  %vm1626_vm4 = vcmp.eq.s32.totalorder %v3142_v28, %v3203_v56  ;;  %vm1690_vm5 = vcmp.eq.s32.totalorder %v3142_v28, %v3226_v12 }
  0x43   : > { %v891_v63 = vadd.f32 %v2487_v45, %v827_v47  ;;  %v2532_v0 = vsel %vm1038_vm13, 1.0, %v2972_v1  ;;  %v2629_v8 = vsel %vm1562_vm2, 1.0, %v2972_v1  ;;  %vm1754_vm6 = vcmp.eq.s32.totalorder %v3142_v28, %v3236_v26 }
  0x44   : > { %v2547_v22 = vsel %vm1102_vm14, 1.0, %v2972_v1  ;;  %v1543_v23 = vadd.f32 %v2614_v60, %v1479_v62  ;;  %vm1818_vm7 = vcmp.eq.s32.totalorder %v3142_v28, %v3240_v29  ;;  %vm1882_vm8 = vcmp.eq.s32.totalorder %v3142_v28, %v3206_v57 }
  0x45   : > { %v2120_v25 = vadd.f32 %v2750_v40, %v2056_v7  ;;  %v955_v9 = vadd.f32 %v2502_v52, %v891_v63  ;;  %v2644_v31 = vsel %vm1626_vm4, 1.0, %v2972_v1  ;;  %v2659_v34 = vsel %vm1690_vm5, 1.0, %v2972_v1 }
  0x46   : > { %v2908_v10 = vpop.eup %2907  ;;  %v1607_v14 = vadd.f32 %v2629_v8, %v1543_v23  ;;  %v2674_v38 = vsel %vm1754_vm6, 1.0, %v2972_v1  ;;  %vm1946_vm9 = vcmp.eq.s32.totalorder %v3142_v28, %v3231_v24  ;;  %v3381_v41 = vadd.s32 96, %v3064_v2 }
  0x47   : > { %v2130_v42 = vmul.f32 0.33333334, %v2908_v10  ;;  %v1019_v44 = vadd.f32 %v2517_v61, %v955_v9  ;;  %v2689_v45 = vsel %vm1818_vm7, 1.0, %v2972_v1  ;;  %v2704_v40 = vsel %vm1882_vm8, 1.0, %v2972_v1 }
  0x48   : > { %v1671_v35 = vadd.f32 %v2644_v31, %v1607_v14  ;;  %vm348_vm10 = vcmp.eq.s32.totalorder %v3381_v41, %v3098_v13  ;;  %vm397_vm11 = vcmp.eq.s32.totalorder %v3381_v41, %v3102_v15  ;;  %vm461_vm12 = vcmp.eq.s32.totalorder %v3381_v41, %v3105_v16 }
  0x49   : > { %v2131_v48 = vmul.f32 %v2130_v42, %v3297_v11  ;;  %v1083_v52 = vadd.f32 %v2532_v0, %v1019_v44  ;;  %v2366_v3 = vsel %vm348_vm10, 1.0, %v2972_v1  ;;  %v2381_v53 = vsel %vm397_vm11, 1.0, %v2972_v1 }
  0x4a   : > { %v1735_v27 = vadd.f32 %v2659_v34, %v1671_v35  ;;  %v442_v55 = vadd.f32 %v2381_v53, %v2366_v3  ;;  %v2396_v58 = vsel %vm461_vm12, 1.0, %v2972_v1  ;;  %vm525_vm13 = vcmp.eq.s32.totalorder %v3381_v41, %v3108_v17 }
  0x4b   : > { %v3398_v7 = vrot.slane %v2131_v48, %v3072_v4  ;;  %v1147_v47 = vadd.f32 %v2547_v22, %v1083_v52  ;;  %v2411_v59 = vsel %vm525_vm13, 1.0, %v2972_v1  ;;  %vm589_vm15 = vcmp.eq.s32.totalorder %v3381_v41, %v3111_v18 }
  0x4c   : > { %v1799_v11 = vadd.f32 %v2674_v38, %v1735_v27  ;;  %vm2010_vm14 = vcmp.eq.s32.totalorder %v3142_v28, %v3260_v37  ;;  %v506_v60 = vadd.f32 %v2396_v58, %v442_v55  ;;  %vm653_vm0 = vcmp.eq.s32.totalorder %v3381_v41, %v3117_v19 }
  0x4d   : > { %v2165_v61 = vmul.f32 %v3398_v7, %v2120_v25  ;;  %v1196_v62 = vmul.f32 %v3328_v46, %v1147_v47  ;;  %vm2074_vm1 = vcmp.eq.s32.totalorder %v3142_v28, %v3272_v6  ;;  %v2426_v63 = vsel %vm589_vm15, 1.0, %v2972_v1 }
  0x4e   : > { %v1863_v0 = vadd.f32 %v2689_v45, %v1799_v11  ;;  %v570_v8 = vadd.f32 %v2411_v59, %v506_v60  ;;  %vm717_vm2 = vcmp.eq.s32.totalorder %v3381_v41, %v3121_v20  ;;  %vm781_vm4 = vcmp.eq.s32.totalorder %v3381_v41, %v3125_v21 }
  0x4f   : > { %2828 = vmatpush3.msk.msra.mxu1 %vm1202_vm3, %v2165_v61  ;;  %2797 = vmatpush3.msra.mxu0 %v1196_v62  ;;  %v2719_v22 = vsel %vm1946_vm9, 1.0, %v2972_v1  ;;  %v2441_v23 = vsel %vm653_vm0, 1.0, %v2972_v1  ;;  %v2734_v9 = vsel %vm2010_vm14, 1.0, %v2972_v1  ;;  %v2749_v31 = vsel %vm2074_vm1, 1.0, %v2972_v1 }
  0x50   : > { %2829 = vmatprep.subr.mxu1 %v2972_v1  ;;  %v1927_v25 = vadd.f32 %v2704_v40, %v1863_v0  ;;  %2798 = vmatprep.subr.mxu0 %v2972_v1  ;;  %v634_v34 = vadd.f32 %v2426_v63, %v570_v8  ;;  %v2456_v10 = vsel %vm717_vm2, 1.0, %v2972_v1  ;;  %v2471_v14 = vsel %vm781_vm4, 1.0, %v2972_v1 }
  0x51   : > { %vm845_vm3 = vcmp.eq.s32.totalorder %v3381_v41, %v3151_v30  ;;  %vm1320_vm5 = vcmp.eq.s32.totalorder %v3381_v41, %v3166_v36  ;;  %vm909_vm6 = vcmp.eq.s32.totalorder %v3381_v41, %v3156_v32  ;;  %vm973_vm7 = vcmp.eq.s32.totalorder %v3381_v41, %v3159_v33 }
  0x52   : > { %v1991_v38 = vadd.f32 %v2719_v22, %v1927_v25  ;;  %v698_v42 = vadd.f32 %v2441_v23, %v634_v34  ;;  %v2568_v28 = vsel %vm1320_vm5, 1.0, %v2972_v1  ;;  %vm1369_vm8 = vcmp.eq.s32.totalorder %v3381_v41, %v3186_v49 }
  0x53   : > { %vm1433_vm9 = vcmp.eq.s32.totalorder %v3381_v41, %v3189_v50  ;;  %vm1497_vm10 = vcmp.eq.s32.totalorder %v3381_v41, %v3192_v51  ;;  %v2583_v40 = vsel %vm1369_vm8, 1.0, %v2972_v1  ;;  %v2486_v48 = vsel %vm845_vm3, 1.0, %v2972_v1 }
  0x54   : > { %v2055_v44 = vadd.f32 %v2734_v9, %v1991_v38  ;;  %v762_v45 = vadd.f32 %v2456_v10, %v698_v42  ;;  %v2598_v35 = vsel %vm1433_vm9, 1.0, %v2972_v1  ;;  %v2501_v52 = vsel %vm909_vm6, 1.0, %v2972_v1 }
  0x55   : > { %v1414_v3 = vadd.f32 %v2583_v40, %v2568_v28  ;;  %vm1561_vm11 = vcmp.eq.s32.totalorder %v3381_v41, %v3198_v54  ;;  %vm1037_vm12 = vcmp.eq.s32.totalorder %v3381_v41, %v3172_v39  ;;  %v2613_v55 = vsel %vm1497_vm10, 1.0, %v2972_v1 }
  0x56   : > { %v2119_v53 = vadd.f32 %v2749_v31, %v2055_v44  ;;  %v826_v27 = vadd.f32 %v2471_v14, %v762_v45  ;;  %vm1101_vm13 = vcmp.eq.s32.totalorder %v3381_v41, %v3180_v43  ;;  %v2628_v47 = vsel %vm1561_vm11, 1.0, %v2972_v1 }
  0x57   : > { %v1478_v58 = vadd.f32 %v2598_v35, %v1414_v3  ;;  %vm1625_vm15 = vcmp.eq.s32.totalorder %v3381_v41, %v3203_v56  ;;  %vm1689_vm14 = vcmp.eq.s32.totalorder %v3381_v41, %v3226_v12  ;;  %vm1753_vm0 = vcmp.eq.s32.totalorder %v3381_v41, %v3236_v26 }
  0x58   : > { %v2164_v59 = vmul.f32 %v3398_v7, %v2119_v53  ;;  %v890_v11 = vadd.f32 %v2486_v48, %v826_v27  ;;  %v2516_v60 = vsel %vm973_vm7, 1.0, %v2972_v1  ;;  %vm1817_vm1 = vcmp.eq.s32.totalorder %v3381_v41, %v3240_v29 }
  0x59   : > { %v1542_v61 = vadd.f32 %v2613_v55, %v1478_v58  ;;  %vm1881_vm2 = vcmp.eq.s32.totalorder %v3381_v41, %v3206_v57  ;;  %v2531_v63 = vsel %vm1037_vm12, 1.0, %v2972_v1  ;;  %v2546_v0 = vsel %vm1101_vm13, 1.0, %v2972_v1 }
  0x5a   : > { %2830 = vmatpush3.msra.mxu1 %v2164_v59  ;;  %v954_v62 = vadd.f32 %v2501_v52, %v890_v11  ;;  %v2643_v8 = vsel %vm1625_vm15, 1.0, %v2972_v1  ;;  %v2658_v23 = vsel %vm1689_vm14, 1.0, %v2972_v1  ;;  %v2673_v25 = vsel %vm1753_vm0, 1.0, %v2972_v1 }
  0x5b   : > { %2831 = vmatprep.subr.mxu1 %v2972_v1  ;;  %v1606_v22 = vadd.f32 %v2628_v47, %v1542_v61  ;;  %v3483_v9 = vadd.s32 88, %v3064_v2  ;;  %v2688_v34 = vsel %vm1817_vm1, 1.0, %v2972_v1  ;;  %v2703_v10 = vsel %vm1881_vm2, 1.0, %v2972_v1 }
  0x5c   : > { %v1018_v31 = vadd.f32 %v2516_v60, %v954_v62  ;;  %vm1945_vm4 = vcmp.eq.s32.totalorder %v3381_v41, %v3231_v24  ;;  %vm2009_vm9 = vcmp.eq.s32.totalorder %v3381_v41, %v3260_v37  ;;  %vm2073_vm10 = vcmp.eq.s32.totalorder %v3381_v41, %v3272_v6 }
  0x5d   : > { %v1670_v14 = vadd.f32 %v2643_v8, %v1606_v22  ;;  %vm347_vm3 = vcmp.eq.s32.totalorder %v3483_v9, %v3098_v13  ;;  %vm396_vm5 = vcmp.eq.s32.totalorder %v3483_v9, %v3102_v15  ;;  %vm460_vm6 = vcmp.eq.s32.totalorder %v3483_v9, %v3105_v16 }
  0x5e   : > { %v1082_v38 = vadd.f32 %v2531_v63, %v1018_v31  ;;  %v2365_v42 = vsel %vm347_vm3, 1.0, %v2972_v1  ;;  %v2380_v28 = vsel %vm396_vm5, 1.0, %v2972_v1  ;;  %v2395_v44 = vsel %vm460_vm6, 1.0, %v2972_v1 }
  0x5f   : > { %v1734_v45 = vadd.f32 %v2658_v23, %v1670_v14  ;;  %v441_v40 = vadd.f32 %v2380_v28, %v2365_v42  ;;  %vm524_vm7 = vcmp.eq.s32.totalorder %v3483_v9, %v3108_v17  ;;  %vm588_vm8 = vcmp.eq.s32.totalorder %v3483_v9, %v3111_v18 }
  0x60   : > { %v1146_v35 = vadd.f32 %v2546_v0, %v1082_v38  ;;  %v2410_v48 = vsel %vm524_vm7, 1.0, %v2972_v1  ;;  %vm652_vm11 = vcmp.eq.s32.totalorder %v3483_v9, %v3117_v19  ;;  %vm716_vm12 = vcmp.eq.s32.totalorder %v3483_v9, %v3121_v20 }
  0x61   : > { %v1798_v52 = vadd.f32 %v2673_v25, %v1734_v45  ;;  %v505_v3 = vadd.f32 %v2395_v44, %v441_v40  ;;  %v2425_v27 = vsel %vm588_vm8, 1.0, %v2972_v1  ;;  %vm780_vm13 = vcmp.eq.s32.totalorder %v3483_v9, %v3125_v21 }
  0x62   : > { %v1195_v53 = vmul.f32 %v3328_v46, %v1146_v35  ;;  %vm844_vm15 = vcmp.eq.s32.totalorder %v3483_v9, %v3151_v30  ;;  %v2718_v58 = vsel %vm1945_vm4, 1.0, %v2972_v1  ;;  %v2733_v47 = vsel %vm2009_vm9, 1.0, %v2972_v1 }
  0x63   : > { %v1862_v55 = vadd.f32 %v2688_v34, %v1798_v52  ;;  %v569_v59 = vadd.f32 %v2410_v48, %v505_v3  ;;  %v2748_v11 = vsel %vm2073_vm10, 1.0, %v2972_v1  ;;  %v2440_v60 = vsel %vm652_vm11, 1.0, %v2972_v1 }
  0x64   : > { %2799 = vmatpush3.msra.mxu0 %v1195_v53  ;;  %v2455_v61 = vsel %vm716_vm12, 1.0, %v2972_v1  ;;  %v3526_v62 = vadd.s32 80, %v3064_v2  ;;  %v2470_v41 = vsel %vm780_vm13, 1.0, %v2972_v1  ;;  %v2485_v8 = vsel %vm844_vm15, 1.0, %v2972_v1 }
  0x65   : > { %v1926_v63 = vadd.f32 %v2703_v10, %v1862_v55  ;;  %2800 = vmatprep.subr.mxu0 %v2972_v1  ;;  %v633_v0 = vadd.f32 %v2425_v27, %v569_v59  ;;  %vm908_vm14 = vcmp.eq.s32.totalorder %v3483_v9, %v3156_v32  ;;  %vm972_vm0 = vcmp.eq.s32.totalorder %v3483_v9, %v3159_v33 }
  0x66   : > { %vm1319_vm1 = vcmp.eq.s32.totalorder %v3483_v9, %v3166_v36  ;;  %vm1368_vm2 = vcmp.eq.s32.totalorder %v3483_v9, %v3186_v49  ;;  %vm1432_vm4 = vcmp.eq.s32.totalorder %v3483_v9, %v3189_v50  ;;  %vm1496_vm3 = vcmp.eq.s32.totalorder %v3483_v9, %v3192_v51 }
  0x67   : > { %v1990_v22 = vadd.f32 %v2718_v58, %v1926_v63  ;;  %v697_v23 = vadd.f32 %v2440_v60, %v633_v0  ;;  %v2567_v25 = vsel %vm1319_vm1, 1.0, %v2972_v1  ;;  %v2582_v31 = vsel %vm1368_vm2, 1.0, %v2972_v1 }
  0x68   : > { %v1413_v34 = vadd.f32 %v2582_v31, %v2567_v25  ;;  %vm1560_vm5 = vcmp.eq.s32.totalorder %v3483_v9, %v3198_v54  ;;  %v2597_v38 = vsel %vm1432_vm4, 1.0, %v2972_v1  ;;  %v2612_v42 = vsel %vm1496_vm3, 1.0, %v2972_v1 }
  0x69   : > { %v2054_v10 = vadd.f32 %v2733_v47, %v1990_v22  ;;  %v761_v14 = vadd.f32 %v2455_v61, %v697_v23  ;;  %vm1036_vm6 = vcmp.eq.s32.totalorder %v3483_v9, %v3172_v39  ;;  %vm1100_vm7 = vcmp.eq.s32.totalorder %v3483_v9, %v3180_v43 }
  0x6a   : > { %v1477_v28 = vadd.f32 %v2597_v38, %v1413_v34  ;;  %vm1624_vm8 = vcmp.eq.s32.totalorder %v3483_v9, %v3203_v56  ;;  %v2500_v40 = vsel %vm908_vm14, 1.0, %v2972_v1  ;;  %v2627_v35 = vsel %vm1560_vm5, 1.0, %v2972_v1 }
  0x6b   : > { %v2118_v44 = vadd.f32 %v2748_v11, %v2054_v10  ;;  %v825_v45 = vadd.f32 %v2470_v41, %v761_v14  ;;  %vm1688_vm9 = vcmp.eq.s32.totalorder %v3483_v9, %v3226_v12  ;;  %vm1752_vm10 = vcmp.eq.s32.totalorder %v3483_v9, %v3236_v26 }
  0x6c   : > { %v1541_v48 = vadd.f32 %v2612_v42, %v1477_v28  ;;  %vm1816_vm11 = vcmp.eq.s32.totalorder %v3483_v9, %v3240_v29  ;;  %v2642_v53 = vsel %vm1624_vm8, 1.0, %v2972_v1  ;;  %vm1880_vm12 = vcmp.eq.s32.totalorder %v3483_v9, %v3206_v57 }
  0x6d   : > { %v2163_v52 = vmul.f32 %v3398_v7, %v2118_v44  ;;  %v889_v3 = vadd.f32 %v2485_v8, %v825_v45  ;;  %v2515_v27 = vsel %vm972_vm0, 1.0, %v2972_v1  ;;  %v2530_v55 = vsel %vm1036_vm6, 1.0, %v2972_v1 }
  0x6e   : > { %v2545_v58 = vsel %vm1100_vm7, 1.0, %v2972_v1  ;;  %v1605_v47 = vadd.f32 %v2627_v35, %v1541_v48  ;;  %v2657_v11 = vsel %vm1688_vm9, 1.0, %v2972_v1  ;;  %v2672_v60 = vsel %vm1752_vm10, 1.0, %v2972_v1 }
  0x6f   : > { %2832 = vmatpush3.msra.mxu1 %v2163_v52  ;;  %v953_v59 = vadd.f32 %v2500_v40, %v889_v3  ;;  %v2687_v61 = vsel %vm1816_vm11, 1.0, %v2972_v1  ;;  %v2702_v0 = vsel %vm1880_vm12, 1.0, %v2972_v1  ;;  %vm346_vm13 = vcmp.eq.s32.totalorder %v3526_v62, %v3098_v13 }
  0x70   : > { %2833 = vmatprep.subr.mxu1 %v2972_v1  ;;  %v1669_v63 = vadd.f32 %v2642_v53, %v1605_v47  ;;  %vm395_vm15 = vcmp.eq.s32.totalorder %v3526_v62, %v3102_v15  ;;  %v2364_v8 = vsel %vm346_vm13, 1.0, %v2972_v1  ;;  %vm459_vm14 = vcmp.eq.s32.totalorder %v3526_v62, %v3105_v16 }
  0x71   : > { %v1017_v41 = vadd.f32 %v2515_v27, %v953_v59  ;;  %v2379_v22 = vsel %vm395_vm15, 1.0, %v2972_v1  ;;  %v2394_v31 = vsel %vm459_vm14, 1.0, %v2972_v1  ;;  %vm523_vm0 = vcmp.eq.s32.totalorder %v3526_v62, %v3108_v17 }
  0x72   : > { %v1733_v23 = vadd.f32 %v2657_v11, %v1669_v63  ;;  %v440_v25 = vadd.f32 %v2379_v22, %v2364_v8  ;;  %vm1944_vm1 = vcmp.eq.s32.totalorder %v3483_v9, %v3231_v24  ;;  %v2409_v10 = vsel %vm523_vm0, 1.0, %v2972_v1 }
  0x73   : > { %v1081_v34 = vadd.f32 %v2530_v55, %v1017_v41  ;;  %vm587_vm2 = vcmp.eq.s32.totalorder %v3526_v62, %v3111_v18  ;;  %vm2008_vm4 = vcmp.eq.s32.totalorder %v3483_v9, %v3260_v37  ;;  %vm651_vm3 = vcmp.eq.s32.totalorder %v3526_v62, %v3117_v19 }
  0x74   : > { %v1797_v14 = vadd.f32 %v2672_v60, %v1733_v23  ;;  %v504_v38 = vadd.f32 %v2394_v31, %v440_v25  ;;  %vm2072_vm5 = vcmp.eq.s32.totalorder %v3483_v9, %v3272_v6  ;;  %v2424_v28 = vsel %vm587_vm2, 1.0, %v2972_v1 }
  0x75   : > { %v1145_v42 = vadd.f32 %v2545_v58, %v1081_v34  ;;  %vm715_vm6 = vcmp.eq.s32.totalorder %v3526_v62, %v3121_v20  ;;  %vm779_vm7 = vcmp.eq.s32.totalorder %v3526_v62, %v3125_v21  ;;  %vm843_vm8 = vcmp.eq.s32.totalorder %v3526_v62, %v3151_v30 }
  0x76   : > { %v1861_v44 = vadd.f32 %v2687_v61, %v1797_v14  ;;  %v568_v45 = vadd.f32 %v2409_v10, %v504_v38  ;;  %v2717_v35 = vsel %vm1944_vm1, 1.0, %v2972_v1  ;;  %v2732_v48 = vsel %vm2008_vm4, 1.0, %v2972_v1 }
  0x77   : > { %v1194_v40 = vmul.f32 %v3328_v46, %v1145_v42  ;;  %v2439_v52 = vsel %vm651_vm3, 1.0, %v2972_v1  ;;  %v2747_v53 = vsel %vm2072_vm5, 1.0, %v2972_v1  ;;  %v2454_v55 = vsel %vm715_vm6, 1.0, %v2972_v1 }
  0x78   : > { %v1925_v3 = vadd.f32 %v2702_v0, %v1861_v44  ;;  %v632_v27 = vadd.f32 %v2424_v28, %v568_v45  ;;  %v2469_v58 = vsel %vm779_vm7, 1.0, %v2972_v1  ;;  %v2484_v47 = vsel %vm843_vm8, 1.0, %v2972_v1 }
  0x79   : > { %2801 = vmatpush3.msra.mxu0 %v1194_v40  ;;  %vm1318_vm9 = vcmp.eq.s32.totalorder %v3526_v62, %v3166_v36  ;;  %vm1367_vm10 = vcmp.eq.s32.totalorder %v3526_v62, %v3186_v49  ;;  %vm907_vm11 = vcmp.eq.s32.totalorder %v3526_v62, %v3156_v32  ;;  %vm971_vm12 = vcmp.eq.s32.totalorder %v3526_v62, %v3159_v33 }
  0x7a   : > { %v1989_v9 = vadd.f32 %v2717_v35, %v1925_v3  ;;  %2802 = vmatprep.subr.mxu0 %v2972_v1  ;;  %v696_v59 = vadd.f32 %v2439_v52, %v632_v27  ;;  %v2566_v11 = vsel %vm1318_vm9, 1.0, %v2972_v1  ;;  %v2581_v60 = vsel %vm1367_vm10, 1.0, %v2972_v1 }
  0x7b   : > { %vm1431_vm13 = vcmp.eq.s32.totalorder %v3526_v62, %v3189_v50  ;;  %vm1495_vm15 = vcmp.eq.s32.totalorder %v3526_v62, %v3192_v51  ;;  %v1412_v0 = vadd.f32 %v2581_v60, %v2566_v11  ;;  %vm1035_vm14 = vcmp.eq.s32.totalorder %v3526_v62, %v3172_v39 }
  0x7c   : > { %v2053_v61 = vadd.f32 %v2732_v48, %v1989_v9  ;;  %v760_v63 = vadd.f32 %v2454_v55, %v696_v59  ;;  %v2596_v41 = vsel %vm1431_vm13, 1.0, %v2972_v1  ;;  %vm1099_vm0 = vcmp.eq.s32.totalorder %v3526_v62, %v3180_v43 }
  0x7d   : > { %v2611_v8 = vsel %vm1495_vm15, 1.0, %v2972_v1  ;;  %vm1559_vm1 = vcmp.eq.s32.totalorder %v3526_v62, %v3198_v54  ;;  %v1476_v25 = vadd.f32 %v2596_v41, %v1412_v0  ;;  %vm1623_vm2 = vcmp.eq.s32.totalorder %v3526_v62, %v3203_v56 }
  0x7e   : > { %v2117_v22 = vadd.f32 %v2747_v53, %v2053_v61  ;;  %v824_v23 = vadd.f32 %v2469_v58, %v760_v63  ;;  %v2499_v31 = vsel %vm907_vm11, 1.0, %v2972_v1  ;;  %v2626_v34 = vsel %vm1559_vm1, 1.0, %v2972_v1 }
  0x7f   : > { %vm1687_vm4 = vcmp.eq.s32.totalorder %v3526_v62, %v3226_v12  ;;  %v3660_v10 = vadd.s32 72, %v3064_v2  ;;  %v1540_v42 = vadd.f32 %v2611_v8, %v1476_v25  ;;  %vm1751_vm3 = vcmp.eq.s32.totalorder %v3526_v62, %v3236_v26 }
  0x80   : > { %v2162_v14 = vmul.f32 %v3398_v7, %v2117_v22  ;;  %v888_v38 = vadd.f32 %v2484_v47, %v824_v23  ;;  %v2514_v28 = vsel %vm971_vm12, 1.0, %v2972_v1  ;;  %v2529_v44 = vsel %vm1035_vm14, 1.0, %v2972_v1 }
  0x81   : > { %v2544_v45 = vsel %vm1099_vm0, 1.0, %v2972_v1  ;;  %v2641_v40 = vsel %vm1623_vm2, 1.0, %v2972_v1  ;;  %v1604_v48 = vadd.f32 %v2626_v34, %v1540_v42  ;;  %v2656_v52 = vsel %vm1687_vm4, 1.0, %v2972_v1 }
  0x82   : > { %2834 = vmatpush3.msra.mxu1 %v2162_v14  ;;  %v952_v35 = vadd.f32 %v2499_v31, %v888_v38  ;;  %vm1815_vm5 = vcmp.eq.s32.totalorder %v3526_v62, %v3240_v29  ;;  %v2671_v3 = vsel %vm1751_vm3, 1.0, %v2972_v1  ;;  %vm1879_vm6 = vcmp.eq.s32.totalorder %v3526_v62, %v3206_v57 }
  0x83   : > { %2835 = vmatprep.subr.mxu1 %v2972_v1  ;;  %vm345_vm7 = vcmp.eq.s32.totalorder %v3660_v10, %v3098_v13  ;;  %vm394_vm8 = vcmp.eq.s32.totalorder %v3660_v10, %v3102_v15  ;;  %v1668_v27 = vadd.f32 %v2641_v40, %v1604_v48  ;;  %vm1943_vm9 = vcmp.eq.s32.totalorder %v3526_v62, %v3231_v24 }
  0x84   : > { %v1016_v53 = vadd.f32 %v2514_v28, %v952_v35  ;;  %v2363_v55 = vsel %vm345_vm7, 1.0, %v2972_v1  ;;  %v2378_v58 = vsel %vm394_vm8, 1.0, %v2972_v1  ;;  %vm458_vm10 = vcmp.eq.s32.totalorder %v3660_v10, %v3105_v16 }
  0x85   : > { %vm522_vm11 = vcmp.eq.s32.totalorder %v3660_v10, %v3108_v17  ;;  %vm586_vm12 = vcmp.eq.s32.totalorder %v3660_v10, %v3111_v18  ;;  %v1732_v9 = vadd.f32 %v2656_v52, %v1668_v27  ;;  %v439_v59 = vadd.f32 %v2378_v58, %v2363_v55 }
  0x86   : > { %v1080_v47 = vadd.f32 %v2529_v44, %v1016_v53  ;;  %v2393_v11 = vsel %vm458_vm10, 1.0, %v2972_v1  ;;  %v2686_v60 = vsel %vm1815_vm5, 1.0, %v2972_v1  ;;  %vm2007_vm13 = vcmp.eq.s32.totalorder %v3526_v62, %v3260_v37 }
  0x87   : > { %vm2071_vm15 = vcmp.eq.s32.totalorder %v3526_v62, %v3272_v6  ;;  %v2408_v61 = vsel %vm522_vm11, 1.0, %v2972_v1  ;;  %v1796_v0 = vadd.f32 %v2671_v3, %v1732_v9  ;;  %v503_v41 = vadd.f32 %v2393_v11, %v439_v59 }
  0x88   : > { %v1144_v63 = vadd.f32 %v2544_v45, %v1080_v47  ;;  %vm650_vm14 = vcmp.eq.s32.totalorder %v3660_v10, %v3117_v19  ;;  %v2701_v8 = vsel %vm1879_vm6, 1.0, %v2972_v1  ;;  %v2716_v22 = vsel %vm1943_vm9, 1.0, %v2972_v1 }
  0x89   : > { %v2423_v23 = vsel %vm586_vm12, 1.0, %v2972_v1  ;;  %vm714_vm0 = vcmp.eq.s32.totalorder %v3660_v10, %v3121_v20  ;;  %v1860_v31 = vadd.f32 %v2686_v60, %v1796_v0  ;;  %v567_v34 = vadd.f32 %v2408_v61, %v503_v41 }
  0x8a   : > { %v1193_v25 = vmul.f32 %v3328_v46, %v1144_v63  ;;  %vm778_vm1 = vcmp.eq.s32.totalorder %v3660_v10, %v3125_v21  ;;  %v2731_v14 = vsel %vm2007_vm13, 1.0, %v2972_v1  ;;  %v2746_v38 = vsel %vm2071_vm15, 1.0, %v2972_v1 }
  0x8b   : > { %v2438_v42 = vsel %vm650_vm14, 1.0, %v2972_v1  ;;  %vm842_vm2 = vcmp.eq.s32.totalorder %v3660_v10, %v3151_v30  ;;  %v1924_v62 = vadd.f32 %v2701_v8, %v1860_v31  ;;  %v631_v28 = vadd.f32 %v2423_v23, %v567_v34 }
  0x8c   : > { %2803 = vmatpush3.msra.mxu0 %v1193_v25  ;;  %v2453_v44 = vsel %vm714_vm0, 1.0, %v2972_v1  ;;  %vm906_vm4 = vcmp.eq.s32.totalorder %v3660_v10, %v3156_v32  ;;  %v2468_v45 = vsel %vm778_vm1, 1.0, %v2972_v1  ;;  %vm1317_vm3 = vcmp.eq.s32.totalorder %v3660_v10, %v3166_v36 }
  0x8d   : > { %2804 = vmatprep.subr.mxu0 %v2972_v1  ;;  %vm1366_vm5 = vcmp.eq.s32.totalorder %v3660_v10, %v3186_v49  ;;  %vm1430_vm6 = vcmp.eq.s32.totalorder %v3660_v10, %v3189_v50  ;;  %v1988_v40 = vadd.f32 %v2716_v22, %v1924_v62  ;;  %v695_v35 = vadd.f32 %v2438_v42, %v631_v28 }
  0x8e   : > { %v2483_v48 = vsel %vm842_vm2, 1.0, %v2972_v1  ;;  %v2565_v52 = vsel %vm1317_vm3, 1.0, %v2972_v1  ;;  %v2498_v3 = vsel %vm906_vm4, 1.0, %v2972_v1  ;;  %v2580_v53 = vsel %vm1366_vm5, 1.0, %v2972_v1 }
  0x8f   : > { %v2595_v27 = vsel %vm1430_vm6, 1.0, %v2972_v1  ;;  %vm1494_vm7 = vcmp.eq.s32.totalorder %v3660_v10, %v3192_v51  ;;  %v2052_v55 = vadd.f32 %v2731_v14, %v1988_v40  ;;  %v759_v58 = vadd.f32 %v2453_v44, %v695_v35 }
  0x90   : > { %v1411_v47 = vadd.f32 %v2580_v53, %v2565_v52  ;;  %vm1558_vm8 = vcmp.eq.s32.totalorder %v3660_v10, %v3198_v54  ;;  %vm970_vm9 = vcmp.eq.s32.totalorder %v3660_v10, %v3159_v33  ;;  %vm1034_vm10 = vcmp.eq.s32.totalorder %v3660_v10, %v3172_v39 }
  0x91   : > { %vm1098_vm11 = vcmp.eq.s32.totalorder %v3660_v10, %v3180_v43  ;;  %v2610_v9 = vsel %vm1494_vm7, 1.0, %v2972_v1  ;;  %v2116_v59 = vadd.f32 %v2746_v38, %v2052_v55  ;;  %v823_v11 = vadd.f32 %v2468_v45, %v759_v58 }
  0x92   : > { %v1475_v60 = vadd.f32 %v2595_v27, %v1411_v47  ;;  %vm1622_vm12 = vcmp.eq.s32.totalorder %v3660_v10, %v3203_v56  ;;  %v2625_v61 = vsel %vm1558_vm8, 1.0, %v2972_v1  ;;  %vm1686_vm13 = vcmp.eq.s32.totalorder %v3660_v10, %v3226_v12 }
  0x93   : > { %vm1750_vm15 = vcmp.eq.s32.totalorder %v3660_v10, %v3236_v26  ;;  %vm1814_vm14 = vcmp.eq.s32.totalorder %v3660_v10, %v3240_v29  ;;  %v2161_v63 = vmul.f32 %v3398_v7, %v2116_v59  ;;  %v887_v0 = vadd.f32 %v2483_v48, %v823_v11 }
  0x94   : > { %v1539_v41 = vadd.f32 %v2610_v9, %v1475_v60  ;;  %vm1878_vm0 = vcmp.eq.s32.totalorder %v3660_v10, %v3206_v57  ;;  %v2513_v8 = vsel %vm970_vm9, 1.0, %v2972_v1  ;;  %v2528_v22 = vsel %vm1034_vm10, 1.0, %v2972_v1 }
  0x95   : > { %v2543_v23 = vsel %vm1098_vm11, 1.0, %v2972_v1  ;;  %v2640_v25 = vsel %vm1622_vm12, 1.0, %v2972_v1  ;;  %2836 = vmatpush3.msra.mxu1 %v2161_v63  ;;  %v951_v31 = vadd.f32 %v2498_v3, %v887_v0  ;;  %v2655_v14 = vsel %vm1686_vm13, 1.0, %v2972_v1 }
  0x96   : > { %v1603_v34 = vadd.f32 %v2625_v61, %v1539_v41  ;;  %v2670_v38 = vsel %vm1750_vm15, 1.0, %v2972_v1  ;;  %2837 = vmatprep.subr.mxu1 %v2972_v1  ;;  %v2685_v42 = vsel %vm1814_vm14, 1.0, %v2972_v1  ;;  %v2700_v62 = vsel %vm1878_vm0, 1.0, %v2972_v1 }
  0x97   : > { %vm1942_vm1 = vcmp.eq.s32.totalorder %v3660_v10, %v3231_v24  ;;  %v3790_v28 = vadd.s32 64, %v3064_v2  ;;  %v1015_v44 = vadd.f32 %v2513_v8, %v951_v31  ;;  %vm2006_vm2 = vcmp.eq.s32.totalorder %v3660_v10, %v3260_v37 }
  0x98   : > { %v1667_v45 = vadd.f32 %v2640_v25, %v1603_v34  ;;  %vm2070_vm4 = vcmp.eq.s32.totalorder %v3660_v10, %v3272_v6  ;;  %v2715_v3 = vsel %vm1942_vm1, 1.0, %v2972_v1  ;;  %v2730_v47 = vsel %vm2006_vm2, 1.0, %v2972_v1 }
  0x99   : > { %vm344_vm3 = vcmp.eq.s32.totalorder %v3790_v28, %v3098_v13  ;;  %vm393_vm5 = vcmp.eq.s32.totalorder %v3790_v28, %v3102_v15  ;;  %vm457_vm6 = vcmp.eq.s32.totalorder %v3790_v28, %v3105_v16  ;;  %vm521_vm7 = vcmp.eq.s32.totalorder %v3790_v28, %v3108_v17 }
  0x9a   : > { %v1079_v40 = vadd.f32 %v2528_v22, %v1015_v44  ;;  %v1731_v35 = vadd.f32 %v2655_v14, %v1667_v45  ;;  %v2362_v48 = vsel %vm344_vm3, 1.0, %v2972_v1  ;;  %v2377_v52 = vsel %vm393_vm5, 1.0, %v2972_v1 }
  0x9b   : > { %v438_v53 = vadd.f32 %v2377_v52, %v2362_v48  ;;  %v2392_v27 = vsel %vm457_vm6, 1.0, %v2972_v1  ;;  %vm585_vm8 = vcmp.eq.s32.totalorder %v3790_v28, %v3111_v18  ;;  %v2407_v9 = vsel %vm521_vm7, 1.0, %v2972_v1 }
  0x9c   : > { %v1143_v55 = vadd.f32 %v2543_v23, %v1079_v40  ;;  %v1795_v58 = vadd.f32 %v2670_v38, %v1731_v35  ;;  %v2745_v59 = vsel %vm2070_vm4, 1.0, %v2972_v1  ;;  %vm649_vm9 = vcmp.eq.s32.totalorder %v3790_v28, %v3117_v19 }
  0x9d   : > { %v502_v11 = vadd.f32 %v2392_v27, %v438_v53  ;;  %vm713_vm10 = vcmp.eq.s32.totalorder %v3790_v28, %v3121_v20  ;;  %v2422_v63 = vsel %vm585_vm8, 1.0, %v2972_v1  ;;  %vm777_vm11 = vcmp.eq.s32.totalorder %v3790_v28, %v3125_v21 }
  0x9e   : > { %v1192_v60 = vmul.f32 %v3328_v46, %v1143_v55  ;;  %v1859_v61 = vadd.f32 %v2685_v42, %v1795_v58  ;;  %v3828_v41 = vadd.s32 56, %v3064_v2  ;;  %v3831_v10 = vadd.s32 48, %v3064_v2 }
  0x9f   : > { %v566_v0 = vadd.f32 %v2407_v9, %v502_v11  ;;  %v3834_v8 = vadd.s32 40, %v3064_v2  ;;  %v2437_v23 = vsel %vm649_vm9, 1.0, %v2972_v1  ;;  %v2452_v25 = vsel %vm713_vm10, 1.0, %v2972_v1 }
  0xa0   : > { %2805 = vmatpush3.msra.mxu0 %v1192_v60  ;;  %v1923_v22 = vadd.f32 %v2700_v62, %v1859_v61  ;;  %v3839_v31 = vadd.s32 32, %v3064_v2  ;;  %v2467_v14 = vsel %vm777_vm11, 1.0, %v2972_v1  ;;  %vm841_vm12 = vcmp.eq.s32.totalorder %v3790_v28, %v3151_v30 }
  0xa1   : > { %2806 = vmatprep.subr.mxu0 %v2972_v1  ;;  %v630_v34 = vadd.f32 %v2422_v63, %v566_v0  ;;  %vm1316_vm13 = vcmp.eq.s32.totalorder %v3790_v28, %v3166_v36  ;;  %vm905_vm15 = vcmp.eq.s32.totalorder %v3790_v28, %v3156_v32  ;;  %vm969_vm14 = vcmp.eq.s32.totalorder %v3790_v28, %v3159_v33 }
  0xa2   : > { %v1987_v38 = vadd.f32 %v2715_v3, %v1923_v22  ;;  %v2564_v42 = vsel %vm1316_vm13, 1.0, %v2972_v1  ;;  %vm1365_vm0 = vcmp.eq.s32.totalorder %v3790_v28, %v3186_v49  ;;  %vm1429_vm1 = vcmp.eq.s32.totalorder %v3790_v28, %v3189_v50 }
  0xa3   : > { %v694_v62 = vadd.f32 %v2437_v23, %v630_v34  ;;  %vm1493_vm2 = vcmp.eq.s32.totalorder %v3790_v28, %v3192_v51  ;;  %v2482_v45 = vsel %vm841_vm12, 1.0, %v2972_v1  ;;  %v2579_v40 = vsel %vm1365_vm0, 1.0, %v2972_v1 }
  0xa4   : > { %v2051_v44 = vadd.f32 %v2730_v47, %v1987_v38  ;;  %v2594_v35 = vsel %vm1429_vm1, 1.0, %v2972_v1  ;;  %v2497_v52 = vsel %vm905_vm15, 1.0, %v2972_v1  ;;  %v1410_v3 = vadd.f32 %v2579_v40, %v2564_v42 }
  0xa5   : > { %v758_v48 = vadd.f32 %v2452_v25, %v694_v62  ;;  %vm1557_vm4 = vcmp.eq.s32.totalorder %v3790_v28, %v3198_v54  ;;  %vm1033_vm3 = vcmp.eq.s32.totalorder %v3790_v28, %v3172_v39  ;;  %vm1097_vm5 = vcmp.eq.s32.totalorder %v3790_v28, %v3180_v43 }
  0xa6   : > { %v2115_v53 = vadd.f32 %v2745_v59, %v2051_v44  ;;  %v2609_v27 = vsel %vm1493_vm2, 1.0, %v2972_v1  ;;  %v1474_v58 = vadd.f32 %v2594_v35, %v1410_v3  ;;  %vm1621_vm6 = vcmp.eq.s32.totalorder %v3790_v28, %v3203_v56 }
  0xa7   : > { %v822_v55 = vadd.f32 %v2467_v14, %v758_v48  ;;  %vm1685_vm7 = vcmp.eq.s32.totalorder %v3790_v28, %v3226_v12  ;;  %v2512_v9 = vsel %vm969_vm14, 1.0, %v2972_v1  ;;  %v2624_v59 = vsel %vm1557_vm4, 1.0, %v2972_v1 }
  0xa8   : > { %v2160_v47 = vmul.f32 %v3398_v7, %v2115_v53  ;;  %vm1749_vm8 = vcmp.eq.s32.totalorder %v3790_v28, %v3236_v26  ;;  %v2527_v60 = vsel %vm1033_vm3, 1.0, %v2972_v1  ;;  %v1538_v61 = vadd.f32 %v2609_v27, %v1474_v58 }
  0xa9   : > { %v886_v11 = vadd.f32 %v2482_v45, %v822_v55  ;;  %vm1813_vm9 = vcmp.eq.s32.totalorder %v3790_v28, %v3240_v29  ;;  %v2542_v63 = vsel %vm1097_vm5, 1.0, %v2972_v1  ;;  %v2639_v0 = vsel %vm1621_vm6, 1.0, %v2972_v1 }
  0xaa   : > { %2838 = vmatpush3.msra.mxu1 %v2160_v47  ;;  %v2654_v22 = vsel %vm1685_vm7, 1.0, %v2972_v1  ;;  %vm343_vm10 = vcmp.eq.s32.totalorder %v3828_v41, %v3098_v13  ;;  %v1602_v25 = vadd.f32 %v2624_v59, %v1538_v61  ;;  %v2669_v34 = vsel %vm1749_vm8, 1.0, %v2972_v1 }
  0xab   : > { %2839 = vmatprep.subr.mxu1 %v2972_v1  ;;  %v950_v23 = vadd.f32 %v2497_v52, %v886_v11  ;;  %vm1877_vm11 = vcmp.eq.s32.totalorder %v3790_v28, %v3206_v57  ;;  %v2684_v14 = vsel %vm1813_vm9, 1.0, %v2972_v1  ;;  %v2361_v38 = vsel %vm343_vm10, 1.0, %v2972_v1 }
  0xac   : > { %vm392_vm12 = vcmp.eq.s32.totalorder %v3828_v41, %v3102_v15  ;;  %vm456_vm13 = vcmp.eq.s32.totalorder %v3828_v41, %v3105_v16  ;;  %v1666_v62 = vadd.f32 %v2639_v0, %v1602_v25  ;;  %vm1941_vm15 = vcmp.eq.s32.totalorder %v3790_v28, %v3231_v24 }
  0xad   : > { %v1014_v42 = vadd.f32 %v2512_v9, %v950_v23  ;;  %v2376_v44 = vsel %vm392_vm12, 1.0, %v2972_v1  ;;  %v2391_v45 = vsel %vm456_vm13, 1.0, %v2972_v1  ;;  %vm520_vm14 = vcmp.eq.s32.totalorder %v3828_v41, %v3108_v17 }
  0xae   : > { %v437_v40 = vadd.f32 %v2376_v44, %v2361_v38  ;;  %vm584_vm0 = vcmp.eq.s32.totalorder %v3828_v41, %v3111_v18  ;;  %v1730_v48 = vadd.f32 %v2654_v22, %v1666_v62  ;;  %vm2005_vm1 = vcmp.eq.s32.totalorder %v3790_v28, %v3260_v37 }
  0xaf   : > { %v1078_v35 = vadd.f32 %v2527_v60, %v1014_v42  ;;  %v2406_v52 = vsel %vm520_vm14, 1.0, %v2972_v1  ;;  %vm2069_vm2 = vcmp.eq.s32.totalorder %v3790_v28, %v3272_v6  ;;  %v2421_v53 = vsel %vm584_vm0, 1.0, %v2972_v1 }
  0xb0   : > { %v501_v3 = vadd.f32 %v2391_v45, %v437_v40  ;;  %vm648_vm4 = vcmp.eq.s32.totalorder %v3828_v41, %v3117_v19  ;;  %v1794_v55 = vadd.f32 %v2669_v34, %v1730_v48  ;;  %vm712_vm3 = vcmp.eq.s32.totalorder %v3828_v41, %v3121_v20 }
  0xb1   : > { %v1142_v27 = vadd.f32 %v2542_v63, %v1078_v35  ;;  %vm776_vm5 = vcmp.eq.s32.totalorder %v3828_v41, %v3125_v21  ;;  %v2699_v58 = vsel %vm1877_vm11, 1.0, %v2972_v1  ;;  %v2714_v47 = vsel %vm1941_vm15, 1.0, %v2972_v1 }
  0xb2   : > { %v2729_v9 = vsel %vm2005_vm1, 1.0, %v2972_v1  ;;  %v565_v59 = vadd.f32 %v2406_v52, %v501_v3  ;;  %v1858_v60 = vadd.f32 %v2684_v14, %v1794_v55  ;;  %v2744_v61 = vsel %vm2069_vm2, 1.0, %v2972_v1 }
  0xb3   : > { %v1191_v11 = vmul.f32 %v3328_v46, %v1142_v27  ;;  %v2436_v63 = vsel %vm648_vm4, 1.0, %v2972_v1  ;;  %v2451_v22 = vsel %vm712_vm3, 1.0, %v2972_v1  ;;  %v2466_v23 = vsel %vm776_vm5, 1.0, %v2972_v1 }
  0xb4   : > { %v629_v0 = vadd.f32 %v2421_v53, %v565_v59  ;;  %vm840_vm6 = vcmp.eq.s32.totalorder %v3828_v41, %v3151_v30  ;;  %v1922_v28 = vadd.f32 %v2699_v58, %v1858_v60  ;;  %vm904_vm7 = vcmp.eq.s32.totalorder %v3828_v41, %v3156_v32 }
  0xb5   : > { %2807 = vmatpush3.msra.mxu0 %v1191_v11  ;;  %vm968_vm8 = vcmp.eq.s32.totalorder %v3828_v41, %v3159_v33  ;;  %vm1315_vm9 = vcmp.eq.s32.totalorder %v3828_v41, %v3166_v36  ;;  %vm1364_vm10 = vcmp.eq.s32.totalorder %v3828_v41, %v3186_v49  ;;  %vm1428_vm11 = vcmp.eq.s32.totalorder %v3828_v41, %v3189_v50 }
  0xb6   : > { %2808 = vmatprep.subr.mxu0 %v2972_v1  ;;  %v693_v25 = vadd.f32 %v2436_v63, %v629_v0  ;;  %v2563_v34 = vsel %vm1315_vm9, 1.0, %v2972_v1  ;;  %v1986_v14 = vadd.f32 %v2714_v47, %v1922_v28  ;;  %v2578_v38 = vsel %vm1364_vm10, 1.0, %v2972_v1 }
  0xb7   : > { %v2593_v42 = vsel %vm1428_vm11, 1.0, %v2972_v1  ;;  %vm1492_vm12 = vcmp.eq.s32.totalorder %v3828_v41, %v3192_v51  ;;  %v2481_v44 = vsel %vm840_vm6, 1.0, %v2972_v1  ;;  %v1409_v45 = vadd.f32 %v2578_v38, %v2563_v34 }
  0xb8   : > { %v757_v62 = vadd.f32 %v2451_v22, %v693_v25  ;;  %vm1556_vm13 = vcmp.eq.s32.totalorder %v3828_v41, %v3198_v54  ;;  %v2050_v40 = vadd.f32 %v2729_v9, %v1986_v14  ;;  %v2496_v35 = vsel %vm904_vm7, 1.0, %v2972_v1 }
  0xb9   : > { %vm1032_vm15 = vcmp.eq.s32.totalorder %v3828_v41, %v3172_v39  ;;  %v2608_v48 = vsel %vm1492_vm12, 1.0, %v2972_v1  ;;  %vm1096_vm14 = vcmp.eq.s32.totalorder %v3828_v41, %v3180_v43  ;;  %v1473_v3 = vadd.f32 %v2593_v42, %v1409_v45 }
  0xba   : > { %v821_v52 = vadd.f32 %v2466_v23, %v757_v62  ;;  %vm1620_vm0 = vcmp.eq.s32.totalorder %v3828_v41, %v3203_v56  ;;  %v2114_v53 = vadd.f32 %v2744_v61, %v2050_v40  ;;  %v2511_v27 = vsel %vm968_vm8, 1.0, %v2972_v1 }
  0xbb   : > { %v2623_v55 = vsel %vm1556_vm13, 1.0, %v2972_v1  ;;  %vm1684_vm1 = vcmp.eq.s32.totalorder %v3828_v41, %v3226_v12  ;;  %v2526_v47 = vsel %vm1032_vm15, 1.0, %v2972_v1  ;;  %v1537_v9 = vadd.f32 %v2608_v48, %v1473_v3 }
  0xbc   : > { %v885_v58 = vadd.f32 %v2481_v44, %v821_v52  ;;  %vm1748_vm2 = vcmp.eq.s32.totalorder %v3828_v41, %v3236_v26  ;;  %v2159_v59 = vmul.f32 %v3398_v7, %v2114_v53  ;;  %v2541_v11 = vsel %vm1096_vm14, 1.0, %v2972_v1 }
  0xbd   : > { %v2638_v60 = vsel %vm1620_vm0, 1.0, %v2972_v1  ;;  %vm1812_vm4 = vcmp.eq.s32.totalorder %v3828_v41, %v3240_v29  ;;  %v1601_v63 = vadd.f32 %v2623_v55, %v1537_v9  ;;  %v2653_v0 = vsel %vm1684_vm1, 1.0, %v2972_v1 }
  0xbe   : > { %v949_v61 = vadd.f32 %v2496_v35, %v885_v58  ;;  %vm1876_vm3 = vcmp.eq.s32.totalorder %v3828_v41, %v3206_v57  ;;  %2840 = vmatpush3.msra.mxu1 %v2159_v59  ;;  %v2668_v22 = vsel %vm1748_vm2, 1.0, %v2972_v1  ;;  %vm342_vm5 = vcmp.eq.s32.totalorder %v3831_v10, %v3098_v13 }
  0xbf   : > { %vm391_vm6 = vcmp.eq.s32.totalorder %v3831_v10, %v3102_v15  ;;  %vm455_vm7 = vcmp.eq.s32.totalorder %v3831_v10, %v3105_v16  ;;  %2841 = vmatprep.subr.mxu1 %v2972_v1  ;;  %v1665_v28 = vadd.f32 %v2638_v60, %v1601_v63  ;;  %v2683_v25 = vsel %vm1812_vm4, 1.0, %v2972_v1 }
  0xc0   : > { %v1013_v23 = vadd.f32 %v2511_v27, %v949_v61  ;;  %v2360_v34 = vsel %vm342_vm5, 1.0, %v2972_v1  ;;  %vm1940_vm8 = vcmp.eq.s32.totalorder %v3828_v41, %v3231_v24  ;;  %v2375_v14 = vsel %vm391_vm6, 1.0, %v2972_v1 }
  0xc1   : > { %v2390_v38 = vsel %vm455_vm7, 1.0, %v2972_v1  ;;  %vm519_vm9 = vcmp.eq.s32.totalorder %v3831_v10, %v3108_v17  ;;  %v1729_v62 = vadd.f32 %v2653_v0, %v1665_v28  ;;  %v436_v44 = vadd.f32 %v2375_v14, %v2360_v34 }
  0xc2   : > { %v1077_v42 = vadd.f32 %v2526_v47, %v1013_v23  ;;  %vm583_vm10 = vcmp.eq.s32.totalorder %v3831_v10, %v3111_v18  ;;  %vm2004_vm11 = vcmp.eq.s32.totalorder %v3828_v41, %v3260_v37  ;;  %vm2068_vm12 = vcmp.eq.s32.totalorder %v3828_v41, %v3272_v6 }
  0xc3   : > { %v2405_v45 = vsel %vm519_vm9, 1.0, %v2972_v1  ;;  %vm647_vm13 = vcmp.eq.s32.totalorder %v3831_v10, %v3117_v19  ;;  %v1793_v35 = vadd.f32 %v2668_v22, %v1729_v62  ;;  %v500_v48 = vadd.f32 %v2390_v38, %v436_v44 }
  0xc4   : > { %v1141_v40 = vadd.f32 %v2541_v11, %v1077_v42  ;;  %vm711_vm15 = vcmp.eq.s32.totalorder %v3831_v10, %v3121_v20  ;;  %v2698_v52 = vsel %vm1876_vm3, 1.0, %v2972_v1  ;;  %v2713_v3 = vsel %vm1940_vm8, 1.0, %v2972_v1 }
  0xc5   : > { %v2420_v53 = vsel %vm583_vm10, 1.0, %v2972_v1  ;;  %vm775_vm14 = vcmp.eq.s32.totalorder %v3831_v10, %v3125_v21  ;;  %v1857_v55 = vadd.f32 %v2683_v25, %v1793_v35  ;;  %v564_v58 = vadd.f32 %v2405_v45, %v500_v48 }
  0xc6   : > { %v1190_v27 = vmul.f32 %v3328_v46, %v1141_v40  ;;  %vm839_vm0 = vcmp.eq.s32.totalorder %v3831_v10, %v3151_v30  ;;  %v2728_v47 = vsel %vm2004_vm11, 1.0, %v2972_v1  ;;  %v2743_v9 = vsel %vm2068_vm12, 1.0, %v2972_v1 }
  0xc7   : > { %v2435_v59 = vsel %vm647_vm13, 1.0, %v2972_v1  ;;  %v2450_v11 = vsel %vm711_vm15, 1.0, %v2972_v1  ;;  %v1921_v60 = vadd.f32 %v2698_v52, %v1857_v55  ;;  %v628_v61 = vadd.f32 %v2420_v53, %v564_v58 }
  0xc8   : > { %2809 = vmatpush3.msra.mxu0 %v1190_v27  ;;  %v2465_v63 = vsel %vm775_vm14, 1.0, %v2972_v1  ;;  %vm903_vm1 = vcmp.eq.s32.totalorder %v3831_v10, %v3156_v32  ;;  %v2480_v0 = vsel %vm839_vm0, 1.0, %v2972_v1  ;;  %vm1314_vm2 = vcmp.eq.s32.totalorder %v3831_v10, %v3166_v36 }
  0xc9   : > { %2810 = vmatprep.subr.mxu0 %v2972_v1  ;;  %vm1363_vm4 = vcmp.eq.s32.totalorder %v3831_v10, %v3186_v49  ;;  %vm1427_vm3 = vcmp.eq.s32.totalorder %v3831_v10, %v3189_v50  ;;  %v1985_v41 = vadd.f32 %v2713_v3, %v1921_v60  ;;  %v692_v22 = vadd.f32 %v2435_v59, %v628_v61 }
  0xca   : > { %v2562_v23 = vsel %vm1314_vm2, 1.0, %v2972_v1  ;;  %v2577_v28 = vsel %vm1363_vm4, 1.0, %v2972_v1  ;;  %v2592_v34 = vsel %vm1427_vm3, 1.0, %v2972_v1  ;;  %vm1491_vm5 = vcmp.eq.s32.totalorder %v3831_v10, %v3192_v51 }
  0xcb   : > { %v1408_v25 = vadd.f32 %v2577_v28, %v2562_v23  ;;  %vm1555_vm6 = vcmp.eq.s32.totalorder %v3831_v10, %v3198_v54  ;;  %v2049_v14 = vadd.f32 %v2728_v47, %v1985_v41  ;;  %v756_v38 = vadd.f32 %v2450_v11, %v692_v22 }
  0xcc   : > { %vm967_vm7 = vcmp.eq.s32.totalorder %v3831_v10, %v3159_v33  ;;  %v2607_v42 = vsel %vm1491_vm5, 1.0, %v2972_v1  ;;  %vm1031_vm8 = vcmp.eq.s32.totalorder %v3831_v10, %v3172_v39  ;;  %vm1095_vm9 = vcmp.eq.s32.totalorder %v3831_v10, %v3180_v43 }
  0xcd   : > { %v1472_v62 = vadd.f32 %v2592_v34, %v1408_v25  ;;  %vm1619_vm10 = vcmp.eq.s32.totalorder %v3831_v10, %v3203_v56  ;;  %v2113_v44 = vadd.f32 %v2743_v9, %v2049_v14  ;;  %v820_v45 = vadd.f32 %v2465_v63, %v756_v38 }
  0xce   : > { %v2622_v40 = vsel %vm1555_vm6, 1.0, %v2972_v1  ;;  %vm1683_vm11 = vcmp.eq.s32.totalorder %v3831_v10, %v3226_v12  ;;  %v2495_v35 = vsel %vm903_vm1, 1.0, %v2972_v1  ;;  %vm1747_vm12 = vcmp.eq.s32.totalorder %v3831_v10, %v3236_v26 }
  0xcf   : > { %v1536_v48 = vadd.f32 %v2607_v42, %v1472_v62  ;;  %vm1811_vm13 = vcmp.eq.s32.totalorder %v3831_v10, %v3240_v29  ;;  %v2158_v52 = vmul.f32 %v3398_v7, %v2113_v44  ;;  %v884_v3 = vadd.f32 %v2480_v0, %v820_v45 }
  0xd0   : > { %v2510_v53 = vsel %vm967_vm7, 1.0, %v2972_v1  ;;  %v2637_v27 = vsel %vm1619_vm10, 1.0, %v2972_v1  ;;  %v2525_v55 = vsel %vm1031_vm8, 1.0, %v2972_v1  ;;  %v2540_v58 = vsel %vm1095_vm9, 1.0, %v2972_v1 }
  0xd1   : > { %v1600_v47 = vadd.f32 %v2622_v40, %v1536_v48  ;;  %v2652_v9 = vsel %vm1683_vm11, 1.0, %v2972_v1  ;;  %2842 = vmatpush3.msra.mxu1 %v2158_v52  ;;  %v948_v59 = vadd.f32 %v2495_v35, %v884_v3  ;;  %v2667_v11 = vsel %vm1747_vm12, 1.0, %v2972_v1 }
  0xd2   : > { %v2682_v60 = vsel %vm1811_vm13, 1.0, %v2972_v1  ;;  %vm1875_vm15 = vcmp.eq.s32.totalorder %v3831_v10, %v3206_v57  ;;  %2843 = vmatprep.subr.mxu1 %v2972_v1  ;;  %vm341_vm14 = vcmp.eq.s32.totalorder %v3834_v8, %v3098_v13  ;;  %vm390_vm0 = vcmp.eq.s32.totalorder %v3834_v8, %v3102_v15 }
  0xd3   : > { %v1664_v61 = vadd.f32 %v2637_v27, %v1600_v47  ;;  %vm454_vm1 = vcmp.eq.s32.totalorder %v3834_v8, %v3105_v16  ;;  %v1012_v63 = vadd.f32 %v2510_v53, %v948_v59  ;;  %v2359_v0 = vsel %vm341_vm14, 1.0, %v2972_v1 }
  0xd4   : > { %v2374_v41 = vsel %vm390_vm0, 1.0, %v2972_v1  ;;  %v2389_v22 = vsel %vm454_vm1, 1.0, %v2972_v1  ;;  %vm518_vm2 = vcmp.eq.s32.totalorder %v3834_v8, %v3108_v17  ;;  %vm582_vm4 = vcmp.eq.s32.totalorder %v3834_v8, %v3111_v18 }
  0xd5   : > { %v1728_v23 = vadd.f32 %v2652_v9, %v1664_v61  ;;  %v435_v28 = vadd.f32 %v2374_v41, %v2359_v0  ;;  %v1076_v25 = vadd.f32 %v2525_v55, %v1012_v63  ;;  %vm1939_vm3 = vcmp.eq.s32.totalorder %v3831_v10, %v3231_v24 }
  0xd6   : > { %vm2003_vm5 = vcmp.eq.s32.totalorder %v3831_v10, %v3260_v37  ;;  %v2404_v34 = vsel %vm518_vm2, 1.0, %v2972_v1  ;;  %vm2067_vm6 = vcmp.eq.s32.totalorder %v3831_v10, %v3272_v6  ;;  %vm646_vm7 = vcmp.eq.s32.totalorder %v3834_v8, %v3117_v19 }
  0xd7   : > { %v1792_v14 = vadd.f32 %v2667_v11, %v1728_v23  ;;  %v499_v38 = vadd.f32 %v2389_v22, %v435_v28  ;;  %v1140_v42 = vadd.f32 %v2540_v58, %v1076_v25  ;;  %v2697_v62 = vsel %vm1875_vm15, 1.0, %v2972_v1 }
  0xd8   : > { %v2419_v44 = vsel %vm582_vm4, 1.0, %v2972_v1  ;;  %vm710_vm8 = vcmp.eq.s32.totalorder %v3834_v8, %v3121_v20  ;;  %v2712_v40 = vsel %vm1939_vm3, 1.0, %v2972_v1  ;;  %vm774_vm9 = vcmp.eq.s32.totalorder %v3834_v8, %v3125_v21 }
  0xd9   : > { %v1856_v45 = vadd.f32 %v2682_v60, %v1792_v14  ;;  %v563_v35 = vadd.f32 %v2404_v34, %v499_v38  ;;  %v1189_v48 = vmul.f32 %v3328_v46, %v1140_v42  ;;  %v2727_v52 = vsel %vm2003_vm5, 1.0, %v2972_v1 }
  0xda   : > { %v2742_v3 = vsel %vm2067_vm6, 1.0, %v2972_v1  ;;  %v2434_v10 = vsel %vm646_vm7, 1.0, %v2972_v1  ;;  %v2449_v55 = vsel %vm710_vm8, 1.0, %v2972_v1  ;;  %vm838_vm10 = vcmp.eq.s32.totalorder %v3834_v8, %v3151_v30 }
  0xdb   : > { %v1920_v53 = vadd.f32 %v2697_v62, %v1856_v45  ;;  %v627_v27 = vadd.f32 %v2419_v44, %v563_v35  ;;  %2811 = vmatpush3.msra.mxu0 %v1189_v48  ;;  %v2464_v58 = vsel %vm774_vm9, 1.0, %v2972_v1  ;;  %vm902_vm11 = vcmp.eq.s32.totalorder %v3834_v8, %v3156_v32 }
  0xdc   : > { %vm1313_vm12 = vcmp.eq.s32.totalorder %v3834_v8, %v3166_v36  ;;  %vm1362_vm13 = vcmp.eq.s32.totalorder %v3834_v8, %v3186_v49  ;;  %2812 = vmatprep.subr.mxu0 %v2972_v1  ;;  %vm966_vm15 = vcmp.eq.s32.totalorder %v3834_v8, %v3159_v33  ;;  %vm1426_vm14 = vcmp.eq.s32.totalorder %v3834_v8, %v3189_v50 }
  0xdd   : > { %v1984_v47 = vadd.f32 %v2712_v40, %v1920_v53  ;;  %v691_v9 = vadd.f32 %v2434_v10, %v627_v27  ;;  %v2561_v59 = vsel %vm1313_vm12, 1.0, %v2972_v1  ;;  %v2576_v11 = vsel %vm1362_vm13, 1.0, %v2972_v1 }
  0xde   : > { %vm1490_vm0 = vcmp.eq.s32.totalorder %v3834_v8, %v3192_v51  ;;  %vm1554_vm1 = vcmp.eq.s32.totalorder %v3834_v8, %v3198_v54  ;;  %v1407_v63 = vadd.f32 %v2576_v11, %v2561_v59  ;;  %v2591_v0 = vsel %vm1426_vm14, 1.0, %v2972_v1 }
  0xdf   : > { %v2048_v60 = vadd.f32 %v2727_v52, %v1984_v47  ;;  %v755_v61 = vadd.f32 %v2449_v55, %v691_v9  ;;  %v2479_v41 = vsel %vm838_vm10, 1.0, %v2972_v1  ;;  %vm1030_vm2 = vcmp.eq.s32.totalorder %v3834_v8, %v3172_v39 }
  0xe0   : > { %vm1094_vm4 = vcmp.eq.s32.totalorder %v3834_v8, %v3180_v43  ;;  %v2606_v22 = vsel %vm1490_vm0, 1.0, %v2972_v1  ;;  %v1471_v25 = vadd.f32 %v2591_v0, %v1407_v63  ;;  %vm1618_vm3 = vcmp.eq.s32.totalorder %v3834_v8, %v3203_v56 }
  0xe1   : > { %v2112_v23 = vadd.f32 %v2742_v3, %v2048_v60  ;;  %v819_v28 = vadd.f32 %v2464_v58, %v755_v61  ;;  %v2494_v34 = vsel %vm902_vm11, 1.0, %v2972_v1  ;;  %v2509_v14 = vsel %vm966_vm15, 1.0, %v2972_v1 }
  0xe2   : > { %v2621_v38 = vsel %vm1554_vm1, 1.0, %v2972_v1  ;;  %vm1682_vm5 = vcmp.eq.s32.totalorder %v3834_v8, %v3226_v12  ;;  %v1535_v44 = vadd.f32 %v2606_v22, %v1471_v25  ;;  %vm1746_vm6 = vcmp.eq.s32.totalorder %v3834_v8, %v3236_v26 }
  0xe3   : > { %v2157_v42 = vmul.f32 %v3398_v7, %v2112_v23  ;;  %v883_v62 = vadd.f32 %v2479_v41, %v819_v28  ;;  %v2524_v45 = vsel %vm1030_vm2, 1.0, %v2972_v1  ;;  %v2539_v40 = vsel %vm1094_vm4, 1.0, %v2972_v1 }
  0xe4   : > { %v2636_v35 = vsel %vm1618_vm3, 1.0, %v2972_v1  ;;  %vm1810_vm7 = vcmp.eq.s32.totalorder %v3834_v8, %v3240_v29  ;;  %v1599_v52 = vadd.f32 %v2621_v38, %v1535_v44  ;;  %v2651_v3 = vsel %vm1682_vm5, 1.0, %v2972_v1 }
  0xe5   : > { %2844 = vmatpush3.msra.mxu1 %v2157_v42  ;;  %v947_v48 = vadd.f32 %v2494_v34, %v883_v62  ;;  %vm1874_vm8 = vcmp.eq.s32.totalorder %v3834_v8, %v3206_v57  ;;  %v2666_v10 = vsel %vm1746_vm6, 1.0, %v2972_v1  ;;  %vm340_vm9 = vcmp.eq.s32.totalorder %v3839_v31, %v3098_v13 }
  0xe6   : > { %2845 = vmatprep.subr.mxu1 %v2972_v1  ;;  %vm389_vm10 = vcmp.eq.s32.totalorder %v3839_v31, %v3102_v15  ;;  %vm453_vm11 = vcmp.eq.s32.totalorder %v3839_v31, %v3105_v16  ;;  %v1663_v27 = vadd.f32 %v2636_v35, %v1599_v52  ;;  %v2681_v55 = vsel %vm1810_vm7, 1.0, %v2972_v1 }
  0xe7   : > { %v1011_v53 = vadd.f32 %v2509_v14, %v947_v48  ;;  %v2358_v58 = vsel %vm340_vm9, 1.0, %v2972_v1  ;;  %vm1938_vm12 = vcmp.eq.s32.totalorder %v3834_v8, %v3231_v24  ;;  %v2373_v47 = vsel %vm389_vm10, 1.0, %v2972_v1 }
  0xe8   : > { %v2388_v9 = vsel %vm453_vm11, 1.0, %v2972_v1  ;;  %vm517_vm13 = vcmp.eq.s32.totalorder %v3839_v31, %v3108_v17  ;;  %v1727_v11 = vadd.f32 %v2651_v3, %v1663_v27  ;;  %v434_v60 = vadd.f32 %v2373_v47, %v2358_v58 }
  0xe9   : > { %v1075_v59 = vadd.f32 %v2524_v45, %v1011_v53  ;;  %vm581_vm15 = vcmp.eq.s32.totalorder %v3839_v31, %v3111_v18  ;;  %vm2002_vm14 = vcmp.eq.s32.totalorder %v3834_v8, %v3260_v37  ;;  %vm2066_vm0 = vcmp.eq.s32.totalorder %v3834_v8, %v3272_v6 }
  0xea   : > { %v2403_v61 = vsel %vm517_vm13, 1.0, %v2972_v1  ;;  %vm645_vm1 = vcmp.eq.s32.totalorder %v3839_v31, %v3117_v19  ;;  %v1791_v0 = vadd.f32 %v2666_v10, %v1727_v11  ;;  %v498_v41 = vadd.f32 %v2388_v9, %v434_v60 }
  0xeb   : > { %v1139_v63 = vadd.f32 %v2539_v40, %v1075_v59  ;;  %vm709_vm2 = vcmp.eq.s32.totalorder %v3839_v31, %v3121_v20  ;;  %v2696_v22 = vsel %vm1874_vm8, 1.0, %v2972_v1  ;;  %v2418_v23 = vsel %vm581_vm15, 1.0, %v2972_v1 }
  0xec   : > { %vm773_vm4 = vcmp.eq.s32.totalorder %v3839_v31, %v3125_v21  ;;  %v1855_v25 = vadd.f32 %v2681_v55, %v1791_v0  ;;  %v2711_v34 = vsel %vm1938_vm12, 1.0, %v2972_v1  ;;  %v562_v14 = vadd.f32 %v2403_v61, %v498_v41 }
  0xed   : > { %v1188_v28 = vmul.f32 %v3328_v46, %v1139_v63  ;;  %v2726_v38 = vsel %vm2002_vm14, 1.0, %v2972_v1  ;;  %v2741_v42 = vsel %vm2066_vm0, 1.0, %v2972_v1  ;;  %v2433_v62 = vsel %vm645_vm1, 1.0, %v2972_v1 }
  0xee   : > { %v2448_v44 = vsel %vm709_vm2, 1.0, %v2972_v1  ;;  %v1919_v45 = vadd.f32 %v2696_v22, %v1855_v25  ;;  %v626_v40 = vadd.f32 %v2418_v23, %v562_v14  ;;  %v2463_v35 = vsel %vm773_vm4, 1.0, %v2972_v1 }
  0xef   : > { %2813 = vmatpush3.msra.mxu0 %v1188_v28  ;;  %vm837_vm3 = vcmp.eq.s32.totalorder %v3839_v31, %v3151_v30  ;;  %vm901_vm5 = vcmp.eq.s32.totalorder %v3839_v31, %v3156_v32  ;;  %vm1312_vm6 = vcmp.eq.s32.totalorder %v3839_v31, %v3166_v36  ;;  %vm1361_vm7 = vcmp.eq.s32.totalorder %v3839_v31, %v3186_v49 }
  0xf0   : > { %2814 = vmatprep.subr.mxu0 %v2972_v1  ;;  %vm1425_vm8 = vcmp.eq.s32.totalorder %v3839_v31, %v3189_v50  ;;  %v1983_v8 = vadd.f32 %v2711_v34, %v1919_v45  ;;  %v690_v48 = vadd.f32 %v2433_v62, %v626_v40  ;;  %v2560_v52 = vsel %vm1312_vm6, 1.0, %v2972_v1 }
  0xf1   : > { %v2575_v3 = vsel %vm1361_vm7, 1.0, %v2972_v1  ;;  %v2590_v53 = vsel %vm1425_vm8, 1.0, %v2972_v1  ;;  %vm1489_vm9 = vcmp.eq.s32.totalorder %v3839_v31, %v3192_v51  ;;  %vm1553_vm10 = vcmp.eq.s32.totalorder %v3839_v31, %v3198_v54 }
  0xf2   : > { %v1406_v10 = vadd.f32 %v2575_v3, %v2560_v52  ;;  %v2047_v27 = vadd.f32 %v2726_v38, %v1983_v8  ;;  %v754_v55 = vadd.f32 %v2448_v44, %v690_v48  ;;  %v2478_v58 = vsel %vm837_vm3, 1.0, %v2972_v1 }
  0xf3   : > { %v2605_v47 = vsel %vm1489_vm9, 1.0, %v2972_v1  ;;  %v2493_v9 = vsel %vm901_vm5, 1.0, %v2972_v1  ;;  %vm965_vm11 = vcmp.eq.s32.totalorder %v3839_v31, %v3159_v33  ;;  %vm1617_vm12 = vcmp.eq.s32.totalorder %v3839_v31, %v3203_v56 }
  0xf4   : > { %v1470_v59 = vadd.f32 %v2590_v53, %v1406_v10  ;;  %v2111_v11 = vadd.f32 %v2741_v42, %v2047_v27  ;;  %v818_v60 = vadd.f32 %v2463_v35, %v754_v55  ;;  %vm1029_vm13 = vcmp.eq.s32.totalorder %v3839_v31, %v3172_v39 }
  0xf5   : > { %v2620_v61 = vsel %vm1553_vm10, 1.0, %v2972_v1  ;;  %vm1093_vm15 = vcmp.eq.s32.totalorder %v3839_v31, %v3180_v43  ;;  %vm1681_vm14 = vcmp.eq.s32.totalorder %v3839_v31, %v3226_v12  ;;  %vm1745_vm0 = vcmp.eq.s32.totalorder %v3839_v31, %v3236_v26 }
  0xf6   : > { %v1534_v63 = vadd.f32 %v2605_v47, %v1470_v59  ;;  %v2156_v0 = vmul.f32 %v3398_v7, %v2111_v11  ;;  %v882_v41 = vadd.f32 %v2478_v58, %v818_v60  ;;  %v2635_v22 = vsel %vm1617_vm12, 1.0, %v2972_v1 }
  0xf7   : > { %vm1809_vm1 = vcmp.eq.s32.totalorder %v3839_v31, %v3240_v29  ;;  %v2508_v23 = vsel %vm965_vm11, 1.0, %v2972_v1  ;;  %vm1873_vm2 = vcmp.eq.s32.totalorder %v3839_v31, %v3206_v57  ;;  %v2523_v34 = vsel %vm1029_vm13, 1.0, %v2972_v1 }
  0xf8   : > { %v1598_v28 = vadd.f32 %v2620_v61, %v1534_v63  ;;  %2846 = vmatpush3.msra.mxu1 %v2156_v0  ;;  %v946_v25 = vadd.f32 %v2493_v9, %v882_v41  ;;  %v2538_v14 = vsel %vm1093_vm15, 1.0, %v2972_v1  ;;  %v2650_v38 = vsel %vm1681_vm14, 1.0, %v2972_v1 }
  0xf9   : > { %2847 = vmatprep.subr.mxu1 %v2972_v1  ;;  %v2665_v62 = vsel %vm1745_vm0, 1.0, %v2972_v1  ;;  %v2680_v44 = vsel %vm1809_vm1, 1.0, %v2972_v1  ;;  %v4284_v45 = vadd.s32 24, %v3064_v2  ;;  %v2695_v35 = vsel %vm1873_vm2, 1.0, %v2972_v1 }
  0xfa   : > { %v1662_v42 = vadd.f32 %v2635_v22, %v1598_v28  ;;  %v1010_v40 = vadd.f32 %v2508_v23, %v946_v25  ;;  %vm1937_vm4 = vcmp.eq.s32.totalorder %v3839_v31, %v3231_v24  ;;  %vm2001_vm3 = vcmp.eq.s32.totalorder %v3839_v31, %v3260_v37 }
  0xfb   : > { %vm339_vm5 = vcmp.eq.s32.totalorder %v4284_v45, %v3098_v13  ;;  %vm388_vm6 = vcmp.eq.s32.totalorder %v4284_v45, %v3102_v15  ;;  %vm452_vm7 = vcmp.eq.s32.totalorder %v4284_v45, %v3105_v16  ;;  %vm516_vm8 = vcmp.eq.s32.totalorder %v4284_v45, %v3108_v17 }
  0xfc   : > { %v1726_v8 = vadd.f32 %v2650_v38, %v1662_v42  ;;  %v1074_v48 = vadd.f32 %v2523_v34, %v1010_v40  ;;  %v2357_v52 = vsel %vm339_vm5, 1.0, %v2972_v1  ;;  %v2372_v3 = vsel %vm388_vm6, 1.0, %v2972_v1 }
  0xfd   : > { %v2387_v10 = vsel %vm452_vm7, 1.0, %v2972_v1  ;;  %v433_v27 = vadd.f32 %v2372_v3, %v2357_v52  ;;  %vm580_vm9 = vcmp.eq.s32.totalorder %v4284_v45, %v3111_v18  ;;  %v2710_v58 = vsel %vm1937_vm4, 1.0, %v2972_v1 }
  0xfe   : > { %v1790_v53 = vadd.f32 %v2665_v62, %v1726_v8  ;;  %v1138_v55 = vadd.f32 %v2538_v14, %v1074_v48  ;;  %vm2065_vm10 = vcmp.eq.s32.totalorder %v3839_v31, %v3272_v6  ;;  %v2402_v47 = vsel %vm516_vm8, 1.0, %v2972_v1 }
  0xff   : > { %v497_v59 = vadd.f32 %v2387_v10, %v433_v27  ;;  %vm644_vm11 = vcmp.eq.s32.totalorder %v4284_v45, %v3117_v19  ;;  %vm708_vm12 = vcmp.eq.s32.totalorder %v4284_v45, %v3121_v20  ;;  %v2417_v60 = vsel %vm580_vm9, 1.0, %v2972_v1 }
 0x100   : > { %v1854_v9 = vadd.f32 %v2680_v44, %v1790_v53  ;;  %v1187_v11 = vmul.f32 %v3328_v46, %v1138_v55  ;;  %vm772_vm13 = vcmp.eq.s32.totalorder %v4284_v45, %v3125_v21  ;;  %vm836_vm15 = vcmp.eq.s32.totalorder %v4284_v45, %v3151_v30 }
 0x101   : > { %v2725_v63 = vsel %vm2001_vm3, 1.0, %v2972_v1  ;;  %v2740_v0 = vsel %vm2065_vm10, 1.0, %v2972_v1  ;;  %v561_v41 = vadd.f32 %v2402_v47, %v497_v59  ;;  %v2432_v22 = vsel %vm644_vm11, 1.0, %v2972_v1 }
 0x102   : > { %v1918_v61 = vadd.f32 %v2695_v35, %v1854_v9  ;;  %2815 = vmatpush3.msra.mxu0 %v1187_v11  ;;  %v2447_v23 = vsel %vm708_vm12, 1.0, %v2972_v1  ;;  %v4326_v28 = vadd.s32 16, %v3064_v2  ;;  %v4329_v25 = vadd.s32 8, %v3064_v2 }
 0x103   : > { %2816 = vmatprep.subr.mxu0 %v2972_v1  ;;  %v625_v14 = vadd.f32 %v2417_v60, %v561_v41  ;;  %v2462_v31 = vsel %vm772_vm13, 1.0, %v2972_v1  ;;  %v2477_v38 = vsel %vm836_vm15, 1.0, %v2972_v1  ;;  %vm900_vm14 = vcmp.eq.s32.totalorder %v4284_v45, %v3156_v32  ;;  %v4378_v60 = vld [vmem:[%s4775_s3] sm:$0x3] }
 0x104   : > { %v1982_v34 = vadd.f32 %v2710_v58, %v1918_v61  ;;  %vm964_vm0 = vcmp.eq.s32.totalorder %v4284_v45, %v3159_v33  ;;  %vm1311_vm1 = vcmp.eq.s32.totalorder %v4284_v45, %v3166_v36  ;;  %vm1360_vm2 = vcmp.eq.s32.totalorder %v4284_v45, %v3186_v49 }
 0x105   : > { %v689_v62 = vadd.f32 %v2432_v22, %v625_v14  ;;  %v2559_v44 = vsel %vm1311_vm1, 1.0, %v2972_v1  ;;  %v2574_v40 = vsel %vm1360_vm2, 1.0, %v2972_v1  ;;  %vm1424_vm4 = vcmp.eq.s32.totalorder %v4284_v45, %v3189_v50 }
 0x106   : > { %v2046_v42 = vadd.f32 %v2725_v63, %v1982_v34  ;;  %v1405_v35 = vadd.f32 %v2574_v40, %v2559_v44  ;;  %vm1488_vm3 = vcmp.eq.s32.totalorder %v4284_v45, %v3192_v51  ;;  %vm1552_vm5 = vcmp.eq.s32.totalorder %v4284_v45, %v3198_v54 }
 0x107   : > { %v753_v48 = vadd.f32 %v2447_v23, %v689_v62  ;;  %v2589_v52 = vsel %vm1424_vm4, 1.0, %v2972_v1  ;;  %v2604_v3 = vsel %vm1488_vm3, 1.0, %v2972_v1  ;;  %vm1028_vm6 = vcmp.eq.s32.totalorder %v4284_v45, %v3172_v39 }
 0x108   : > { %v2110_v8 = vadd.f32 %v2740_v0, %v2046_v42  ;;  %vm1092_vm7 = vcmp.eq.s32.totalorder %v4284_v45, %v3180_v43  ;;  %v1469_v10 = vadd.f32 %v2589_v52, %v1405_v35  ;;  %vm1616_vm8 = vcmp.eq.s32.totalorder %v4284_v45, %v3203_v56 }
 0x109   : > { %v817_v27 = vadd.f32 %v2462_v31, %v753_v48  ;;  %v2619_v55 = vsel %vm1552_vm5, 1.0, %v2972_v1  ;;  %vm1680_vm9 = vcmp.eq.s32.totalorder %v4284_v45, %v3226_v12  ;;  %v2492_v58 = vsel %vm900_vm14, 1.0, %v2972_v1 }
 0x10a   : > { %v2155_v53 = vmul.f32 %v3398_v7, %v2110_v8  ;;  %v1533_v47 = vadd.f32 %v2604_v3, %v1469_v10  ;;  %vm1744_vm10 = vcmp.eq.s32.totalorder %v4284_v45, %v3236_v26  ;;  %vm1808_vm11 = vcmp.eq.s32.totalorder %v4284_v45, %v3240_v29 }
 0x10b   : > { %v881_v9 = vadd.f32 %v2477_v38, %v817_v27  ;;  %v2507_v59 = vsel %vm964_vm0, 1.0, %v2972_v1  ;;  %v2634_v11 = vsel %vm1616_vm8, 1.0, %v2972_v1  ;;  %v4382_v61 = vrot.slane %v4378_v60, %v3072_v4 }
 0x10c   : > { %2848 = vmatpush3.msra.mxu1 %v2155_v53  ;;  %v2522_v63 = vsel %vm1028_vm6, 1.0, %v2972_v1  ;;  %v2537_v0 = vsel %vm1092_vm7, 1.0, %v2972_v1  ;;  %v1597_v41 = vadd.f32 %v2619_v55, %v1533_v47  ;;  %v2649_v22 = vsel %vm1680_vm9, 1.0, %v2972_v1 }
 0x10d   : > { %2849 = vmatprep.subr.mxu1 %v2972_v1  ;;  %v945_v23 = vadd.f32 %v2492_v58, %v881_v9  ;;  %v2664_v34 = vsel %vm1744_vm10, 1.0, %v2972_v1  ;;  %v2679_v14 = vsel %vm1808_vm11, 1.0, %v2972_v1  ;;  %vm1872_vm12 = vcmp.eq.s32.totalorder %v4284_v45, %v3206_v57 }
 0x10e   : > { %v1661_v31 = vadd.f32 %v2634_v11, %v1597_v41  ;;  %vm338_vm13 = vcmp.eq.s32.totalorder %v4326_v28, %v3098_v13  ;;  %vm387_vm15 = vcmp.eq.s32.totalorder %v4326_v28, %v3102_v15  ;;  %vm451_vm14 = vcmp.eq.s32.totalorder %v4326_v28, %v3105_v16 }
 0x10f   : > { %v1009_v38 = vadd.f32 %v2507_v59, %v945_v23  ;;  %v2356_v42 = vsel %vm338_vm13, 1.0, %v2972_v1  ;;  %v2371_v62 = vsel %vm387_vm15, 1.0, %v2972_v1  ;;  %v2386_v44 = vsel %vm451_vm14, 1.0, %v2972_v1 }
 0x110   : > { %v1725_v40 = vadd.f32 %v2649_v22, %v1661_v31  ;;  %v432_v35 = vadd.f32 %v2371_v62, %v2356_v42  ;;  %vm515_vm0 = vcmp.eq.s32.totalorder %v4326_v28, %v3108_v17  ;;  %vm579_vm1 = vcmp.eq.s32.totalorder %v4326_v28, %v3111_v18 }
 0x111   : > { %v1073_v8 = vadd.f32 %v2522_v63, %v1009_v38  ;;  %vm1936_vm2 = vcmp.eq.s32.totalorder %v4284_v45, %v3231_v24  ;;  %vm2000_vm4 = vcmp.eq.s32.totalorder %v4284_v45, %v3260_v37  ;;  %v2401_v48 = vsel %vm515_vm0, 1.0, %v2972_v1 }
 0x112   : > { %v1789_v52 = vadd.f32 %v2664_v34, %v1725_v40  ;;  %vm2064_vm3 = vcmp.eq.s32.totalorder %v4284_v45, %v3272_v6  ;;  %v496_v3 = vadd.f32 %v2386_v44, %v432_v35  ;;  %vm643_vm5 = vcmp.eq.s32.totalorder %v4326_v28, %v3117_v19 }
 0x113   : > { %v1137_v10 = vadd.f32 %v2537_v0, %v1073_v8  ;;  %v2694_v53 = vsel %vm1872_vm12, 1.0, %v2972_v1  ;;  %v2416_v27 = vsel %vm579_vm1, 1.0, %v2972_v1  ;;  %vm707_vm6 = vcmp.eq.s32.totalorder %v4326_v28, %v3121_v20 }
 0x114   : > { %v1853_v55 = vadd.f32 %v2679_v14, %v1789_v52  ;;  %v2709_v58 = vsel %vm1936_vm2, 1.0, %v2972_v1  ;;  %v560_v47 = vadd.f32 %v2401_v48, %v496_v3  ;;  %vm771_vm7 = vcmp.eq.s32.totalorder %v4326_v28, %v3125_v21 }
 0x115   : > { %v1186_v9 = vmul.f32 %v3328_v46, %v1137_v10  ;;  %v2724_v59 = vsel %vm2000_vm4, 1.0, %v2972_v1  ;;  %v2739_v11 = vsel %vm2064_vm3, 1.0, %v2972_v1  ;;  %v2431_v45 = vsel %vm643_vm5, 1.0, %v2972_v1 }
 0x116   : > { %v1917_v63 = vadd.f32 %v2694_v53, %v1853_v55  ;;  %v624_v0 = vadd.f32 %v2416_v27, %v560_v47  ;;  %v2446_v41 = vsel %vm707_vm6, 1.0, %v2972_v1  ;;  %vm835_vm8 = vcmp.eq.s32.totalorder %v4326_v28, %v3151_v30 }
 0x117   : > { %2817 = vmatpush3.msra.mxu0 %v1186_v9  ;;  %v2461_v22 = vsel %vm771_vm7, 1.0, %v2972_v1  ;;  %vm899_vm9 = vcmp.eq.s32.totalorder %v4326_v28, %v3156_v32  ;;  %vm1310_vm10 = vcmp.eq.s32.totalorder %v4326_v28, %v3166_v36  ;;  %vm1359_vm11 = vcmp.eq.s32.totalorder %v4326_v28, %v3186_v49 }
 0x118   : > { %v1981_v23 = vadd.f32 %v2709_v58, %v1917_v63  ;;  %2818 = vmatprep.subr.mxu0 %v2972_v1  ;;  %v688_v34 = vadd.f32 %v2431_v45, %v624_v0  ;;  %vm963_vm12 = vcmp.eq.s32.totalorder %v4326_v28, %v3159_v33  ;;  %v2558_v14 = vsel %vm1310_vm10, 1.0, %v2972_v1 }
 0x119   : > { %v2573_v31 = vsel %vm1359_vm11, 1.0, %v2972_v1  ;;  %vm1423_vm13 = vcmp.eq.s32.totalorder %v4326_v28, %v3189_v50  ;;  %vm1487_vm15 = vcmp.eq.s32.totalorder %v4326_v28, %v3192_v51  ;;  %vm1551_vm14 = vcmp.eq.s32.totalorder %v4326_v28, %v3198_v54 }
 0x11a   : > { %v2045_v38 = vadd.f32 %v2724_v59, %v1981_v23  ;;  %v752_v42 = vadd.f32 %v2446_v41, %v688_v34  ;;  %v1404_v62 = vadd.f32 %v2573_v31, %v2558_v14  ;;  %v2588_v44 = vsel %vm1423_vm13, 1.0, %v2972_v1 }
 0x11b   : > { %v2476_v40 = vsel %vm835_vm8, 1.0, %v2972_v1  ;;  %vm1027_vm0 = vcmp.eq.s32.totalorder %v4326_v28, %v3172_v39  ;;  %vm1091_vm1 = vcmp.eq.s32.totalorder %v4326_v28, %v3180_v43  ;;  %v2603_v35 = vsel %vm1487_vm15, 1.0, %v2972_v1 }
 0x11c   : > { %v2109_v8 = vadd.f32 %v2739_v11, %v2045_v38  ;;  %v816_v48 = vadd.f32 %v2461_v22, %v752_v42  ;;  %v1468_v52 = vadd.f32 %v2588_v44, %v1404_v62  ;;  %vm1615_vm2 = vcmp.eq.s32.totalorder %v4326_v28, %v3203_v56 }
 0x11d   : > { %v2491_v3 = vsel %vm899_vm9, 1.0, %v2972_v1  ;;  %v2506_v10 = vsel %vm963_vm12, 1.0, %v2972_v1  ;;  %v2618_v53 = vsel %vm1551_vm14, 1.0, %v2972_v1  ;;  %vm1679_vm4 = vcmp.eq.s32.totalorder %v4326_v28, %v3226_v12 }
 0x11e   : > { %v2154_v27 = vmul.f32 %v3398_v7, %v2109_v8  ;;  %v880_v55 = vadd.f32 %v2476_v40, %v816_v48  ;;  %v1532_v58 = vadd.f32 %v2603_v35, %v1468_v52  ;;  %vm1743_vm3 = vcmp.eq.s32.totalorder %v4326_v28, %v3236_v26 }
 0x11f   : > { %v2521_v47 = vsel %vm1027_vm0, 1.0, %v2972_v1  ;;  %v2536_v9 = vsel %vm1091_vm1, 1.0, %v2972_v1  ;;  %v2633_v59 = vsel %vm1615_vm2, 1.0, %v2972_v1  ;;  %vm1807_vm5 = vcmp.eq.s32.totalorder %v4326_v28, %v3240_v29 }
 0x120   : > { %2850 = vmatpush3.msra.mxu1 %v2154_v27  ;;  %v944_v11 = vadd.f32 %v2491_v3, %v880_v55  ;;  %v1596_v45 = vadd.f32 %v2618_v53, %v1532_v58  ;;  %v2648_v63 = vsel %vm1679_vm4, 1.0, %v2972_v1  ;;  %vm1871_vm6 = vcmp.eq.s32.totalorder %v4326_v28, %v3206_v57 }
 0x121   : > { %2851 = vmatprep.subr.mxu1 %v2972_v1  ;;  %v2663_v0 = vsel %vm1743_vm3, 1.0, %v2972_v1  ;;  %vm337_vm7 = vcmp.eq.s32.totalorder %v4329_v25, %v3098_v13  ;;  %vm386_vm8 = vcmp.eq.s32.totalorder %v4329_v25, %v3102_v15  ;;  %vm450_vm9 = vcmp.eq.s32.totalorder %v4329_v25, %v3105_v16 }
 0x122   : > { %v1008_v41 = vadd.f32 %v2506_v10, %v944_v11  ;;  %v1660_v22 = vadd.f32 %v2633_v59, %v1596_v45  ;;  %v2678_v23 = vsel %vm1807_vm5, 1.0, %v2972_v1  ;;  %v2355_v34 = vsel %vm337_vm7, 1.0, %v2972_v1 }
 0x123   : > { %vm1935_vm10 = vcmp.eq.s32.totalorder %v4326_v28, %v3231_v24  ;;  %v2370_v14 = vsel %vm386_vm8, 1.0, %v2972_v1  ;;  %v2385_v31 = vsel %vm450_vm9, 1.0, %v2972_v1  ;;  %vm514_vm11 = vcmp.eq.s32.totalorder %v4329_v25, %v3108_v17 }
 0x124   : > { %v1072_v38 = vadd.f32 %v2521_v47, %v1008_v41  ;;  %v1724_v42 = vadd.f32 %v2648_v63, %v1660_v22  ;;  %v431_v62 = vadd.f32 %v2370_v14, %v2355_v34  ;;  %vm578_vm12 = vcmp.eq.s32.totalorder %v4329_v25, %v3111_v18 }
 0x125   : > { %vm1999_vm13 = vcmp.eq.s32.totalorder %v4326_v28, %v3260_v37  ;;  %vm2063_vm15 = vcmp.eq.s32.totalorder %v4326_v28, %v3272_v6  ;;  %v2400_v44 = vsel %vm514_vm11, 1.0, %v2972_v1  ;;  %vm642_vm14 = vcmp.eq.s32.totalorder %v4329_v25, %v3117_v19 }
 0x126   : > { %v1136_v40 = vadd.f32 %v2536_v9, %v1072_v38  ;;  %v1788_v35 = vadd.f32 %v2663_v0, %v1724_v42  ;;  %v495_v8 = vadd.f32 %v2385_v31, %v431_v62  ;;  %vm706_vm0 = vcmp.eq.s32.totalorder %v4329_v25, %v3121_v20 }
 0x127   : > { %v2693_v48 = vsel %vm1871_vm6, 1.0, %v2972_v1  ;;  %v2708_v52 = vsel %vm1935_vm10, 1.0, %v2972_v1  ;;  %v2415_v3 = vsel %vm578_vm12, 1.0, %v2972_v1  ;;  %vm770_vm1 = vcmp.eq.s32.totalorder %v4329_v25, %v3125_v21 }
 0x128   : > { %v1185_v10 = vmul.f32 %v3328_v46, %v1136_v40  ;;  %v1852_v53 = vadd.f32 %v2678_v23, %v1788_v35  ;;  %v559_v27 = vadd.f32 %v2400_v44, %v495_v8  ;;  %vm834_vm2 = vcmp.eq.s32.totalorder %v4329_v25, %v3151_v30 }
 0x129   : > { %v2723_v55 = vsel %vm1999_vm13, 1.0, %v2972_v1  ;;  %v2738_v58 = vsel %vm2063_vm15, 1.0, %v2972_v1  ;;  %v2430_v47 = vsel %vm642_vm14, 1.0, %v2972_v1  ;;  %v2445_v9 = vsel %vm706_vm0, 1.0, %v2972_v1 }
 0x12a   : > { %2819 = vmatpush3.msra.mxu0 %v1185_v10  ;;  %v1916_v46 = vadd.f32 %v2693_v48, %v1852_v53  ;;  %v623_v59 = vadd.f32 %v2415_v3, %v559_v27  ;;  %v2460_v11 = vsel %vm770_vm1, 1.0, %v2972_v1  ;;  %vm898_vm4 = vcmp.eq.s32.totalorder %v4329_v25, %v3156_v32 }
 0x12b   : > { %vm336_vm3 = vcmp.eq.s32.totalorder %v3064_v2, %v3098_v13  ;;  %2820 = vmatprep.subr.mxu0 %v2972_v1  ;;  %v2475_v28 = vsel %vm834_vm2, 1.0, %v2972_v1  ;;  %vm1309_vm5 = vcmp.eq.s32.totalorder %v4329_v25, %v3166_v36  ;;  %vm1358_vm6 = vcmp.eq.s32.totalorder %v4329_v25, %v3186_v49 }
 0x12c   : > { %vm1422_vm7 = vcmp.eq.s32.totalorder %v4329_v25, %v3189_v50  ;;  %v1980_v45 = vadd.f32 %v2708_v52, %v1916_v46  ;;  %v687_v63 = vadd.f32 %v2430_v47, %v623_v59  ;;  %v2557_v0 = vsel %vm1309_vm5, 1.0, %v2972_v1 }
 0x12d   : > { %v2572_v41 = vsel %vm1358_vm6, 1.0, %v2972_v1  ;;  %v2587_v23 = vsel %vm1422_vm7, 1.0, %v2972_v1  ;;  %vm1486_vm8 = vcmp.eq.s32.totalorder %v4329_v25, %v3192_v51  ;;  %vm1550_vm9 = vcmp.eq.s32.totalorder %v4329_v25, %v3198_v54 }
 0x12e   : > { %v1403_v22 = vadd.f32 %v2572_v41, %v2557_v0  ;;  %v2044_v34 = vadd.f32 %v2723_v55, %v1980_v45  ;;  %v751_v14 = vadd.f32 %v2445_v9, %v687_v63  ;;  %vm962_vm10 = vcmp.eq.s32.totalorder %v4329_v25, %v3159_v33 }
 0x12f   : > { %v2602_v31 = vsel %vm1486_vm8, 1.0, %v2972_v1  ;;  %vm1026_vm11 = vcmp.eq.s32.totalorder %v4329_v25, %v3172_v39  ;;  %vm1090_vm12 = vcmp.eq.s32.totalorder %v4329_v25, %v3180_v43  ;;  %vm1614_vm13 = vcmp.eq.s32.totalorder %v4329_v25, %v3203_v56 }
 0x130   : > { %v1467_v38 = vadd.f32 %v2587_v23, %v1403_v22  ;;  %v2108_v42 = vadd.f32 %v2738_v58, %v2044_v34  ;;  %v815_v62 = vadd.f32 %v2460_v11, %v751_v14  ;;  %v2617_v44 = vsel %vm1550_vm9, 1.0, %v2972_v1 }
 0x131   : > { %vm1678_vm15 = vcmp.eq.s32.totalorder %v4329_v25, %v3226_v12  ;;  %v2490_v40 = vsel %vm898_vm4, 1.0, %v2972_v1  ;;  %vm1742_vm14 = vcmp.eq.s32.totalorder %v4329_v25, %v3236_v26  ;;  %vm385_vm0 = vcmp.eq.s32.totalorder %v3064_v2, %v3102_v15 }
 0x132   : > { %v1531_v35 = vadd.f32 %v2602_v31, %v1467_v38  ;;  %v2153_v8 = vmul.f32 %v3398_v7, %v2108_v42  ;;  %v879_v48 = vadd.f32 %v2475_v28, %v815_v62  ;;  %v2505_v52 = vsel %vm962_vm10, 1.0, %v2972_v1 }
 0x133   : > { %v2632_v3 = vsel %vm1614_vm13, 1.0, %v2972_v1  ;;  %v2520_v10 = vsel %vm1026_vm11, 1.0, %v2972_v1  ;;  %v2535_v53 = vsel %vm1090_vm12, 1.0, %v2972_v1  ;;  %v2647_v7 = vsel %vm1678_vm15, 1.0, %v2972_v1 }
 0x134   : > { %v1595_v27 = vadd.f32 %v2617_v44, %v1531_v35  ;;  %2852 = vmatpush3.msra.mxu1 %v2153_v8  ;;  %v943_v55 = vadd.f32 %v2490_v40, %v879_v48  ;;  %v2662_v58 = vsel %vm1742_vm14, 1.0, %v2972_v1  ;;  %vm1806_vm1 = vcmp.eq.s32.totalorder %v4329_v25, %v3240_v29 }
 0x135   : > { %vm1870_vm2 = vcmp.eq.s32.totalorder %v4329_v25, %v3206_v57  ;;  %2853 = vmatprep.subr.mxu1 %v2972_v1  ;;  %v2354_v9 = vsel %vm336_vm3, 1.0, %v2972_v1  ;;  %v2369_v46 = vsel %vm385_vm0, 1.0, %v2972_v1  ;;  %vm449_vm4 = vcmp.eq.s32.totalorder %v3064_v2, %v3105_v16 }
 0x136   : > { %v1659_v47 = vadd.f32 %v2632_v3, %v1595_v27  ;;  %v1007_v59 = vadd.f32 %v2505_v52, %v943_v55  ;;  %v430_v11 = vadd.f32 %v2369_v46, %v2354_v9  ;;  %v2384_v28 = vsel %vm449_vm4, 1.0, %v2972_v1 }
 0x137   : > { %vm513_vm5 = vcmp.eq.s32.totalorder %v3064_v2, %v3108_v17  ;;  %v2677_v63 = vsel %vm1806_vm1, 1.0, %v2972_v1  ;;  %vm577_vm3 = vcmp.eq.s32.totalorder %v3064_v2, %v3111_v18  ;;  %vm1934_vm6 = vcmp.eq.s32.totalorder %v4329_v25, %v3231_v24 }
 0x138   : > { %v1723_v45 = vadd.f32 %v2647_v7, %v1659_v47  ;;  %v2399_v13 = vsel %vm513_vm5, 1.0, %v2972_v1  ;;  %v1071_v15 = vadd.f32 %v2520_v10, %v1007_v59  ;;  %v494_v16 = vadd.f32 %v2384_v28, %v430_v11 }
 0x139   : > { %vm641_vm7 = vcmp.eq.s32.totalorder %v3064_v2, %v3117_v19  ;;  %vm1998_vm8 = vcmp.eq.s32.totalorder %v4329_v25, %v3260_v37  ;;  %vm2062_vm9 = vcmp.eq.s32.totalorder %v4329_v25, %v3272_v6  ;;  %v2414_v17 = vsel %vm577_vm3, 1.0, %v2972_v1 }
 0x13a   : > { %v1787_v0 = vadd.f32 %v2662_v58, %v1723_v45  ;;  %v1135_v41 = vadd.f32 %v2535_v53, %v1071_v15  ;;  %v2692_v18 = vsel %vm1870_vm2, 1.0, %v2972_v1  ;;  %v558_v22 = vadd.f32 %v2399_v13, %v494_v16  ;;  %v295_v58 = vld [vmem:[%s4777_s5] sm:$0xff] }
 0x13b   : > { %vm705_vm10 = vcmp.eq.s32.totalorder %v3064_v2, %v3121_v20  ;;  %v2707_v23 = vsel %vm1934_vm6, 1.0, %v2972_v1  ;;  %v2429_v34 = vsel %vm641_vm7, 1.0, %v2972_v1  ;;  %vm769_vm11 = vcmp.eq.s32.totalorder %v3064_v2, %v3125_v21  ;;  %v294_v15 = vld [vmem:[%s4776_s4] sm:$0xff] }
 0x13c   : > { %v1851_v19 = vadd.f32 %v2677_v63, %v1787_v0  ;;  %v1184_v14 = vmul.f32 %v4382_v61, %v1135_v41  ;;  %v2722_v31 = vsel %vm1998_vm8, 1.0, %v2972_v1  ;;  %v2737_v38 = vsel %vm2062_vm9, 1.0, %v2972_v1 }
 0x13d   : > { %v622_v25 = vadd.f32 %v2414_v17, %v558_v22  ;;  %v2444_v62 = vsel %vm705_vm10, 1.0, %v2972_v1  ;;  %vm833_vm12 = vcmp.eq.s32.totalorder %v3064_v2, %v3151_v30  ;;  %v2459_v44 = vsel %vm769_vm11, 1.0, %v2972_v1 }
 0x13e   : > { %v1915_v42 = vadd.f32 %v2692_v18, %v1851_v19  ;;  %2821 = vmatpush3.msra.mxu0 %v1184_v14  ;;  %vm897_vm13 = vcmp.eq.s32.totalorder %v3064_v2, %v3156_v32  ;;  %vm2973_vm15 = vmmov 0   ;;  %vm1308_vm14 = vcmp.eq.s32.totalorder %v3064_v2, %v3166_v36 }
 0x13f   : > { %v686_v20 = vadd.f32 %v2429_v34, %v622_v25  ;;  %2824 = vmatprep.mubr.msk.f32.mxu0 %vm2973_vm15, %v2972_v1  ;;  %2822 = vmatprep.subr.mxu0 %v2972_v1  ;;  %v2556_v40 = vsel %vm1308_vm14, 1.0, %v2972_v1  ;;  %vm1357_vm0 = vcmp.eq.s32.totalorder %v3064_v2, %v3186_v49  ;;  %vm1421_vm1 = vcmp.eq.s32.totalorder %v3064_v2, %v3189_v50 }
 0x140   : > { %v1979_v21 = vadd.f32 %v2707_v23, %v1915_v42  ;;  %2857 = vmatprep.mubr.msk.f32.mxu1 %vm2973_vm15, %v2972_v1  ;;  %v2571_v8 = vsel %vm1357_vm0, 1.0, %v2972_v1  ;;  %v2586_v48 = vsel %vm1421_vm1, 1.0, %v2972_v1  ;;  %vm1485_vm2 = vcmp.eq.s32.totalorder %v3064_v2, %v3192_v51 }
 0x141   : > { %v750_v35 = vadd.f32 %v2444_v62, %v686_v20  ;;  %v2474_v52 = vsel %vm833_vm12, 1.0, %v2972_v1  ;;  %v1402_v49 = vadd.f32 %v2571_v8, %v2556_v40  ;;  %vm1549_vm4 = vcmp.eq.s32.totalorder %v3064_v2, %v3198_v54 }
 0x142   : > { %v2043_v36 = vadd.f32 %v2722_v31, %v1979_v21  ;;  %vm961_vm5 = vcmp.eq.s32.totalorder %v3064_v2, %v3159_v33  ;;  %v2601_v3 = vsel %vm1485_vm2, 1.0, %v2972_v1  ;;  %v2489_v51 = vsel %vm897_vm13, 1.0, %v2972_v1  ;;  %v2552_v31 = vld [vmem:[%s279_s13 + $0x1] sm:$0x1] }
 0x143   : > { %v814_v50 = vadd.f32 %v2459_v44, %v750_v35  ;;  %v1466_v53 = vadd.f32 %v2586_v48, %v1402_v49  ;;  %vm1613_vm3 = vcmp.eq.s32.totalorder %v3064_v2, %v3203_v56  ;;  %vm1025_vm6 = vcmp.eq.s32.totalorder %v3064_v2, %v3172_v39 }
 0x144   : > { %v2107_v10 = vadd.f32 %v2737_v38, %v2043_v36  ;;  %v2616_v54 = vsel %vm1549_vm4, 1.0, %v2972_v1  ;;  %v2504_v27 = vsel %vm961_vm5, 1.0, %v2972_v1  ;;  %vm1677_vm7 = vcmp.eq.s32.totalorder %v3064_v2, %v3226_v12 }
 0x145   : > { %v878_v30 = vadd.f32 %v2474_v52, %v814_v50  ;;  %v1530_v7 = vadd.f32 %v2601_v3, %v1466_v53  ;;  %vm1089_vm8 = vcmp.eq.s32.totalorder %v3064_v2, %v3180_v43  ;;  %v2631_v56 = vsel %vm1613_vm3, 1.0, %v2972_v1 }
 0x146   : > { %v2152_v33 = vmul.f32 %v2107_v10, %v4382_v61  ;;  %v2519_v55 = vsel %vm1025_vm6, 1.0, %v2972_v1  ;;  %vm1741_vm9 = vcmp.eq.s32.totalorder %v3064_v2, %v3236_v26  ;;  %v2646_v47 = vsel %vm1677_vm7, 1.0, %v2972_v1 }
 0x147   : > { %v942_v32 = vadd.f32 %v2489_v51, %v878_v30  ;;  %v1594_v39 = vadd.f32 %v2616_v54, %v1530_v7  ;;  %v2534_v43 = vsel %vm1089_vm8, 1.0, %v2972_v1  ;;  %vm1805_vm10 = vcmp.eq.s32.totalorder %v3064_v2, %v3240_v29 }
 0x148   : > { %2854 = vmatpush3.msra.mxu1 %v2152_v33  ;;  %v2974_v46 = vmov 0   ;;  %v2661_v26 = vsel %vm1741_vm9, 1.0, %v2972_v1  ;;  %vm1869_vm11 = vcmp.eq.s32.totalorder %v3064_v2, %v3206_v57  ;;  %v2676_v45 = vsel %vm1805_vm10, 1.0, %v2972_v1 }
 0x149   : > { %2855 = vmatprep.subr.mxu1 %v2972_v1  ;;  %v1006_v12 = vadd.f32 %v2504_v27, %v942_v32  ;;  %v1658_v9 = vadd.f32 %v2631_v56, %v1594_v39  ;;  %2904 = vset.pattern.permute.xlu0 %v2974_v46  ;;  %vm1933_vm12 = vcmp.eq.s32.totalorder %v3064_v2, %v3231_v24  ;;  %v2691_v29 = vsel %vm1869_vm11, 1.0, %v2972_v1 }
 0x14a   : > { %1290 = vperm.xlu0 %2904, %v295_v58   ;;  %vm1198_vm13 = vcmask 949248   ;;  %vm1997_vm15 = vcmp.eq.s32.totalorder %v3064_v2, %v3260_v37  ;;  %v2706_v57 = vsel %vm1933_vm12, 1.0, %v2972_v1  ;;  %vm2061_vm14 = vcmp.eq.s32.totalorder %v3064_v2, %v3272_v6  ;;  %v328_v37 = vld [vmem:[%s279_s13] sm:$0x1] }
 0x14b   : > { %v1070_v59 = vadd.f32 %v2519_v55, %v1006_v12  ;;  %v1722_v11 = vadd.f32 %v2646_v47, %v1658_v9  ;;  %v2721_v24 = vsel %vm1997_vm15, 1.0, %v2972_v1  ;;  %v2736_v41 = vsel %vm2061_vm14, 1.0, %v2972_v1 }
 0x14c   : > { %v1276_v23 = vmul.f32 2.0, %v328_v37  ;;  %v1287_v2 = vrot.slane %v4378_v60, %v3075_v5  ;;  %vm1295_vm0 = vcmask 662528   ;;  %v2239_v42 = vmul.f32 2.0, %v2552_v31 }
 0x14d   : > { %v1134_v28 = vadd.f32 %v2534_v43, %v1070_v59  ;;  %v1786_v63 = vadd.f32 %v2661_v26, %v1722_v11 }
 0x14e   : > { %v1281_v1 = vrot.slane %v1276_v23, %v3072_v4  ;;  %v2244_v62 = vrot.slane %v2239_v42, %v3072_v4 }
 0x14f   : > { %v1183_v13 = vmul.f32 %v4382_v61, %v1134_v28  ;;  %v1850_v16 = vadd.f32 %v2676_v45, %v1786_v63 }
 0x151   : > { %2823 = vmatpush3.msra.mxu0 %v1183_v13  ;;  %v1914_v0 = vadd.f32 %v2691_v29, %v1850_v16 }
 0x152   : > { %2825 = vmatmul.mubr.msk.f32.vlgmr.msra.gmra.mxu0 %vm1198_vm13, %v294_v15 }
 0x153   : > { %v1978_v17 = vadd.f32 %v2706_v57, %v1914_v0 }
 0x155   : > { %v2042_v18 = vadd.f32 %v2721_v24, %v1978_v17 }
 0x157   : > { %v2106_v22 = vadd.f32 %v2736_v41, %v2042_v18 }
 0x159   : > { %v2151_v19 = vmul.f32 %v2106_v22, %v4382_v61 }
 0x15b   : > { %2856 = vmatpush3.msra.mxu1 %v2151_v19 }
 0x15c   : > { %2858 = vmatmul.mubr.msk.f32.vlgmr.msra.gmra.mxu1 %vm1198_vm13, %v294_v15 }
 0x1c5   : > { %v1291_v6 = vpop.permute.xlu0 %1290 }
 0x1c6   : > { %v1293_v34 = vmul.f32 %v1291_v6, %v1287_v2 }
 0x212   : > { %v1272_v14 = vpop.f32.mrf.mxu0 }
 0x213   : > { %v1283_v61 = vadd.f32 %v1281_v1, %v1272_v14 }
 0x214   : > { %v2826_v38 = vpop.f32.mrf.mxu0 }
 0x215   : > { %v1294_v25 = vadd.f32 %v1293_v34, %v1283_v61 }
 0x217   : > { %1296 = vst.msk [vmem:[%s275_s9] sm:$0xff] %vm1295_vm0, %v1294_v25 }
 0x21c   : > { %v2235_v5 = vpop.f32.mrf.mxu1 }
 0x21d   : > { %v2246_v60 = vadd.f32 %v2244_v62, %v2235_v5 }
 0x21e   : > { %v2859_v20 = vpop.f32.mrf.mxu1 }
 0x21f   : > { %v2247_v44 = vadd.f32 %v2246_v60, %v1293_v34 }
 0x221   : > { %2754 = vst.msk [vmem:[%s275_s9 + $0x8] sm:$0xff] %vm1295_vm0, %v2247_v44 }
 0x222   : > { %2923 = shalt.err (!%p2920_p3)
}
 0x223   : > { %s2924_s11 = scalar_lea.hbm %s4728_s20, 256  ;;  %s2928_s14 = scalar_lea.hbm %s4778_s6, 512 }
 0x224   : > { %p2925_p4 = scmp.ne.s32.totalorder %s4728_s20, %s2924_s11  ;;  %p2929_p9 = scmp.lt.s32.totalorder %s4728_s20, %s4778_s6 }
 0x225   : > { %p2930_p10 = scmp.lt.s32.totalorder %s2928_s14, %s2924_s11 }
 0x226   : > { %p2926_p7 = pnand %p2925_p4, %p3051_p5 }
 0x227   : > { %p2931_p11 = por %p2930_p10, %p2929_p9 }
 0x228   : > { %p2927_p8 = pneg %p2926_p7 }
 0x22a   : > { %p2932_p12 = pnand %p2931_p11, %p2927_p8 }
 0x22c   : > { %2935 = shalt.err (!%p2932_p12)
}
 0x22d   : > { %s2976_s17 = smov 128   ;;  %s2977_s18 = smov 8  }
 0x22e   : > { %2860 = dma.vmem_to_hbm [thread:$0]  (%p3051_p5), %s4730_s16, 256, %s4728_s20, %s4732_s26, %s2976_s17, %s2976_s17, %s2977_s18  }
 0x22f PF: > { %p2866_p13 = scmp.ge.s32.totalorder %s2970_s24, 2  ;;  %s2279_s19 = sand.u32 1, %s2958_s21  }
 0x230   : > { %s2280_s28 = scalar_lea.sflag [#allocation3], %s2279_s19 }
 0x231   : > { %p2863_p0 = pnand %p2866_p13, %p3055_p6 }
 0x233   : > { %p2864_p1 = pneg %p2863_p0 }
 0x235   : > { %2953 = dma.done.wait (%p2864_p1), %s2280_s28, 256  }
 0x236   : > { %2955 = vsyncadd (%p2864_p1), %s2280_s28, 4294967040  ;;  %p16_p2 = scmp.ge.s32.totalorder %s3038_s27, 4   ;;  %s4781_s21 = smov %s2962_s22 }
 0x237   : > { %s4782_s22 = smov %s2966_s23  ;;  %s4783_s23 = smov %s3049_s30 }
 0x238   : > { %s4784_s24 = smov %s3038_s27  ;;  %18 = sbr.rel (!%p16_p2) target bundleno = 3 (0x3), region = 89 }
 0x23d   :  { %2285 = vsyncpa [#allocation3], 1 }
 0x23e   :  { %2287 = vsyncpa [#allocation3 + $0x1], 1 }

</bundles_post_ra>
